<compile_context>
chip_gen: v5e
topology: v5e:2x2
jax: 0.10.0
libtpu: 0.0.40
codegen_flags: <defaults>
</compile_context>

<pallas_src>
import functools

import jax
import jax.numpy as jnp
from jax.experimental import pallas as pl
from jax.experimental.pallas import tpu as pltpu


# --------------------------- Kernel 1: SparseLinear (edge SpMM) -------------

def _edge_spmm_kernel(src_ref, dst_ref, ew_ref, w_ref, b_ref, out_ref):
    # out[n, :] = sum_{e : dst[e] == n} ew[e] * W[src[e], :]   (+ bias at end)
    e = pl.program_id(0)

    @pl.when(e == 0)
    def _init():
        out_ref[...] = jnp.zeros_like(out_ref)

    src = src_ref[...]                                   # (Et, 1) int32
    dst = dst_ref[...]                                   # (Et, 1) int32
    ew = ew_ref[...]                                     # (Et, 1) float32
    et = src.shape[0]
    n = w_ref.shape[0]

    node_ids = jax.lax.broadcasted_iota(jnp.int32, (et, n), 1)
    onehot_src = (node_ids == src).astype(jnp.float32)   # (Et, N)
    onehot_dst = (node_ids == dst).astype(jnp.float32)   # (Et, N)

    # Gather W[src] via MXU, apply edge weights (padded edges have ew == 0).
    msg = jnp.dot(onehot_src, w_ref[...],
                  preferred_element_type=jnp.float32) * ew        # (Et, H)
    # Scatter-add to destination nodes via MXU (contract the edge axis).
    out_ref[...] += jax.lax.dot_general(
        onehot_dst, msg,
        dimension_numbers=(((0,), (0,)), ((), ())),
        preferred_element_type=jnp.float32)                       # (N, H)

    @pl.when(e == pl.num_programs(0) - 1)
    def _finalize():
        out_ref[...] += b_ref[...]                       # SparseLinear bias


def _edge_spmm(src, dst, ew, w_edge, b_edge, *, edge_tile):
    e_pad = src.shape[0]
    n, h = w_edge.shape
    row = lambda e: (e, 0)
    full = lambda e: (0, 0)
    return pl.pallas_call(
        _edge_spmm_kernel,
        out_shape=jax.ShapeDtypeStruct((n, h), jnp.float32),
        grid=(e_pad // edge_tile,),
        in_specs=[
            pl.BlockSpec((edge_tile, 1), row),           # src
            pl.BlockSpec((edge_tile, 1), row),           # dst
            pl.BlockSpec((edge_tile, 1), row),           # edge weights
            pl.BlockSpec((n, h), full),                  # SparseLinear weight
            pl.BlockSpec((1, h), full),                  # SparseLinear bias
        ],
        out_specs=pl.BlockSpec((n, h), full),            # resident accumulator
        compiler_params=pltpu.CompilerParams(
            dimension_semantics=("arbitrary",)),
    )(src[:, None], dst[:, None], ew[:, None], w_edge, b_edge[None, :])


# --------------------------- Kernel 2: fused dense path ---------------------

def _linkx_dense_kernel(out_e_ref, x_ref, wl_ref, emb_ref,
                        w_nx_ref, w_ne_ref, b_n_ref,
                        w_c1_ref, b_c1_ref,
                        w_c2_ref, b_c2_ref,
                        w_f_ref, b_f_ref,
                        y_ref):
    f32 = jnp.float32
    oe = out_e_ref[...]                                  # (T, H)

    # out = out + cat_lin1(out)
    out = oe + jnp.dot(oe, w_c1_ref[...],
                       preferred_element_type=f32) + b_c1_ref[...]

    # WL embedding lookup as a one-hot matmul (no dynamic gather).
    wl = wl_ref[...]                                     # (T, 1) int32
    t = wl.shape[0]
    num_wl = emb_ref.shape[0]
    wl_ids = jax.lax.broadcasted_iota(jnp.int32, (t, num_wl), 1)
    emb = jnp.dot((wl_ids == wl).astype(f32), emb_ref[...],
                  preferred_element_type=f32)            # (T, D)

    # node_mlp(concat(x, emb)) with the weight split to avoid a lane concat.
    xh = (jnp.dot(x_ref[...], w_nx_ref[...], preferred_element_type=f32)
          + jnp.dot(emb, w_ne_ref[...], preferred_element_type=f32)
          + b_n_ref[...])                                # (T, H)

    out = out + xh
    out = out + jnp.dot(xh, w_c2_ref[...],
                        preferred_element_type=f32) + b_c2_ref[...]
    out = jnp.maximum(out, 0.0)                          # relu_

    # final_mlp: single plain Linear (num_layers=1, dropout=0.0).
    y_ref[...] = (jnp.dot(out, w_f_ref[...], preferred_element_type=f32)
                  + b_f_ref[...]).astype(y_ref.dtype)


def _linkx_dense(out_e, x, wl, params, *, node_tile):
    n, h = out_e.shape
    f = x.shape[1]
    num_wl, d = params["wl_emb"].shape
    o = params["w_final"].shape[1]

    row = lambda i: (i, 0)
    full = lambda i: (0, 0)

    return pl.pallas_call(
        _linkx_dense_kernel,
        out_shape=jax.ShapeDtypeStruct((n, o), jnp.float32),
        grid=(n // node_tile,),
        in_specs=[
            pl.BlockSpec((node_tile, h), row),           # edge-branch output
            pl.BlockSpec((node_tile, f), row),           # node features x
            pl.BlockSpec((node_tile, 1), row),           # wl indices
            pl.BlockSpec((num_wl, d), full),             # wl embedding table
            pl.BlockSpec((f, h), full),                  # node_mlp W (x part)
            pl.BlockSpec((d, h), full),                  # node_mlp W (emb part)
            pl.BlockSpec((1, h), full),                  # node_mlp bias
            pl.BlockSpec((h, h), full),                  # cat_lin1 W
            pl.BlockSpec((1, h), full),                  # cat_lin1 b
            pl.BlockSpec((h, h), full),                  # cat_lin2 W
            pl.BlockSpec((1, h), full),                  # cat_lin2 b
            pl.BlockSpec((h, o), full),                  # final W
            pl.BlockSpec((1, o), full),                  # final b
        ],
        out_specs=pl.BlockSpec((node_tile, o), row),
        compiler_params=pltpu.CompilerParams(
            dimension_semantics=("parallel",)),
    )(out_e, x, wl[:, None], params["wl_emb"],
      params["w_node_x"], params["w_node_e"], params["b_node"][None, :],
      params["w_cat1"], params["b_cat1"][None, :],
      params["w_cat2"], params["b_cat2"][None, :],
      params["w_final"], params["b_final"][None, :])


# --------------------------- wrapper -----------------------------------------

@functools.partial(jax.jit, static_argnames=("edge_tile", "node_tile"))
def _linkx_wl_forward_impl(params, wl_indices, x, src, dst, ew,
                           *, edge_tile, node_tile):
    out_e = _edge_spmm(src, dst, ew, params["w_edge"], params["b_edge"],
                       edge_tile=edge_tile)
    return _linkx_dense(out_e, x, wl_indices, params, node_tile=node_tile)


def linkx_wl_forward(params, wl_indices, x, edge_index, edge_weight=None,
                     *, edge_tile=128, node_tile=64):
    """JAX/Pallas equivalent of LINKX_WL.forward (defaults: 1-layer MLPs)."""
    src = edge_index[0].astype(jnp.int32)
    dst = edge_index[1].astype(jnp.int32)
    e = src.shape[0]
    ew = (jnp.ones((e,), jnp.float32) if edge_weight is None
          else edge_weight.astype(jnp.float32))
    # Pad the edge list to a tile multiple; padded edges carry weight 0.
    pad = (-e) % edge_tile
    if pad:
        src = jnp.concatenate([src, jnp.zeros((pad,), jnp.int32)])
        dst = jnp.concatenate([dst, jnp.zeros((pad,), jnp.int32)])
        ew = jnp.concatenate([ew, jnp.zeros((pad,), jnp.float32)])
    n = params["w_edge"].shape[0]
    assert n % node_tile == 0, "num_nodes must be a multiple of node_tile"
    return _linkx_wl_forward_impl(params, wl_indices.astype(jnp.int32),
                                  x.astype(jnp.float32), src, dst, ew,
                                  edge_tile=edge_tile, node_tile=node_tile)


# --------------------------- demo / correctness check -----------------------

if __name__ == "__main__":
    key = jax.random.PRNGKey(0)
    num_nodes, in_channels, hidden, out_channels = 128, 32, 64, 16
    wl_emb_dim, num_wl, num_edges = 8, 10, 512

    keys = jax.random.split(key, 16)
    s = 0.1
    params = {
        "w_edge":  s * jax.random.normal(keys[0], (num_nodes, hidden), jnp.float32),
        "b_edge":  s * jax.random.normal(keys[1], (hidden,), jnp.float32),
        "wl_emb":  s * jax.random.normal(keys[2], (num_wl, wl_emb_dim), jnp.float32),
        "w_node_x": s * jax.random.normal(keys[3], (in_channels, hidden), jnp.float32),
        "w_node_e": s * jax.random.normal(keys[4], (wl_emb_dim, hidden), jnp.float32),
        "b_node":  s * jax.random.normal(keys[5], (hidden,), jnp.float32),
        "w_cat1":  s * jax.random.normal(keys[6], (hidden, hidden), jnp.float32),
        "b_cat1":  s * jax.random.normal(keys[7], (hidden,), jnp.float32),
        "w_cat2":  s * jax.random.normal(keys[8], (hidden, hidden), jnp.float32),
        "b_cat2":  s * jax.random.normal(keys[9], (hidden,), jnp.float32),
        "w_final": s * jax.random.normal(keys[10], (hidden, out_channels), jnp.float32),
        "b_final": s * jax.random.normal(keys[11], (out_channels,), jnp.float32),
    }

    edge_index = jax.random.randint(keys[12], (2, num_edges), 0, num_nodes,
                                    dtype=jnp.int32)
    wl_indices = jax.random.randint(keys[13], (num_nodes,), 0, num_wl,
                                    dtype=jnp.int32)
    x = jax.random.normal(keys[14], (num_nodes, in_channels), jnp.float32)

    y = linkx_wl_forward(params, wl_indices, x, edge_index)
    jax.block_until_ready(y)

    # Pure-JAX reference of the same forward pass.
    src, dst = edge_index[0], edge_index[1]
    adj = jnp.zeros((num_nodes, num_nodes), jnp.float32).at[dst, src].add(1.0)
    out = adj @ params["w_edge"] + params["b_edge"]
    out = out + out @ params["w_cat1"] + params["b_cat1"]
    emb = params["wl_emb"][wl_indices]
    xh = x @ params["w_node_x"] + emb @ params["w_node_e"] + params["b_node"]
    out = out + xh
    out = out + xh @ params["w_cat2"] + params["b_cat2"]
    out = jnp.maximum(out, 0.0)
    y_ref = out @ params["w_final"] + params["b_final"]

    assert y.shape == (num_nodes, out_channels)
    max_err = float(jnp.max(jnp.abs(y - y_ref)))
    assert bool(jnp.allclose(y, y_ref, atol=3e-2, rtol=3e-2)), \
        f"mismatch vs reference, max abs err = {max_err}"

    print("KERNEL_OK")
</pallas_src>

<mosaic_0001>
module attributes {stable_mosaic.version = 11 : i64} {
  func.func @_edge_spmm_kernel(%arg0: i32, %arg1: memref<128x1xi32, #tpu.memory_space<vmem>>, %arg2: memref<128x1xi32, #tpu.memory_space<vmem>>, %arg3: memref<128x1xf32, #tpu.memory_space<vmem>>, %arg4: memref<128x64xf32, #tpu.memory_space<vmem>>, %arg5: memref<1x64xf32, #tpu.memory_space<vmem>>, %arg6: memref<128x64xf32, #tpu.memory_space<vmem>>) attributes {dimension_semantics = [#tpu.dimension_semantics<arbitrary>], iteration_bounds = array<i64: 4>, scalar_prefetch = 0 : i64, scratch_operands = 0 : i64, tpu.core_type = #tpu.core_type<tc>, window_params = [{transform_indices = @transform_0, window_bounds = array<i64: 128, 1>}, {transform_indices = @transform_1, window_bounds = array<i64: 128, 1>}, {transform_indices = @transform_2, window_bounds = array<i64: 128, 1>}, {pipeline_mode = #tpu.pipeline_mode<synchronous>, transform_indices = @transform_3, window_bounds = array<i64: 128, 64>}, {pipeline_mode = #tpu.pipeline_mode<synchronous>, transform_indices = @transform_4, window_bounds = array<i64: 1, 64>}, {pipeline_mode = #tpu.pipeline_mode<synchronous>, transform_indices = @transform_5, window_bounds = array<i64: 128, 64>}]} {
    %c0_i32 = arith.constant 0 : i32
    %0 = arith.cmpi eq, %arg0, %c0_i32 : i32
    %1 = arith.extui %0 : i1 to i32
    %c0_i32_0 = arith.constant 0 : i32
    %2 = arith.cmpi ne, %1, %c0_i32_0 : i32
    scf.if %2 {
      %cst_14 = arith.constant 0.000000e+00 : f32
      %26 = vector.broadcast %cst_14 : f32 to vector<128x64xf32>
      %c0_15 = arith.constant 0 : index
      %c0_16 = arith.constant 0 : index
      %27 = vector.load %arg6[%c0_15, %c0_16] : memref<128x64xf32, #tpu.memory_space<vmem>>, vector<128x64xf32>
      tpu.vector_store %arg6[%c0_15, %c0_16], %26 {strides = array<i32>} : memref<128x64xf32, #tpu.memory_space<vmem>>, vector<128x64xf32>,
    } else {
    }
    %c0 = arith.constant 0 : index
    %c0_1 = arith.constant 0 : index
    %3 = vector.load %arg1[%c0, %c0_1] : memref<128x1xi32, #tpu.memory_space<vmem>>, vector<128x1xi32>
    %c0_2 = arith.constant 0 : index
    %c0_3 = arith.constant 0 : index
    %4 = vector.load %arg2[%c0_2, %c0_3] : memref<128x1xi32, #tpu.memory_space<vmem>>, vector<128x1xi32>
    %c0_4 = arith.constant 0 : index
    %c0_5 = arith.constant 0 : index
    %5 = vector.load %arg3[%c0_4, %c0_5] : memref<128x1xf32, #tpu.memory_space<vmem>>, vector<128x1xf32>
    %6 = tpu.iota {dimensions = array<i32: 1>} : vector<128x128xi32>
    %7 = vector.broadcast %3 : vector<128x1xi32> to vector<128x128xi32>
    %8 = arith.cmpi eq, %6, %7 : vector<128x128xi32>
    %9 = arith.extui %8 : vector<128x128xi1> to vector<128x128xi32>
    %10 = arith.sitofp %9 : vector<128x128xi32> to vector<128x128xf32>
    %11 = vector.broadcast %4 : vector<128x1xi32> to vector<128x128xi32>
    %12 = arith.cmpi eq, %6, %11 : vector<128x128xi32>
    %13 = arith.extui %12 : vector<128x128xi1> to vector<128x128xi32>
    %14 = arith.sitofp %13 : vector<128x128xi32> to vector<128x128xf32>
    %c0_6 = arith.constant 0 : index
    %c0_7 = arith.constant 0 : index
    %15 = vector.load %arg4[%c0_6, %c0_7] : memref<128x64xf32, #tpu.memory_space<vmem>>, vector<128x64xf32>
    %cst = arith.constant dense<0.000000e+00> : vector<128x64xf32>
    %16 = tpu.matmul %10, %15, %cst {dimension_numbers = #tpu.dot_dimension_numbers<[1], [0], [0], [1], [0, 0, 1, 1], [], []>} : vector<128x128xf32>, vector<128x64xf32>, vector<128x64xf32> -> vector<128x64xf32>
    %17 = vector.broadcast %5 : vector<128x1xf32> to vector<128x64xf32>
    %18 = arith.mulf %16, %17 : vector<128x64xf32>
    %c0_8 = arith.constant 0 : index
    %c0_9 = arith.constant 0 : index
    %19 = vector.load %arg6[%c0_8, %c0_9] : memref<128x64xf32, #tpu.memory_space<vmem>>, vector<128x64xf32>
    %cst_10 = arith.constant dense<0.000000e+00> : vector<128x64xf32>
    %20 = tpu.matmul %14, %18, %cst_10 {dimension_numbers = #tpu.dot_dimension_numbers<[0], [0], [1], [1], [0, 1, 1, 1], [], []>} : vector<128x128xf32>, vector<128x64xf32>, vector<128x64xf32> -> vector<128x64xf32>
    %21 = arith.addf %19, %20 : vector<128x64xf32>
    %c0_11 = arith.constant 0 : index
    %c0_12 = arith.constant 0 : index
    %22 = vector.load %arg6[%c0_11, %c0_12] : memref<128x64xf32, #tpu.memory_space<vmem>>, vector<128x64xf32>
    tpu.vector_store %arg6[%c0_11, %c0_12], %21 {strides = array<i32>} : memref<128x64xf32, #tpu.memory_space<vmem>>, vector<128x64xf32>,
    %c3_i32 = arith.constant 3 : i32
    %23 = arith.cmpi eq, %arg0, %c3_i32 : i32
    %24 = arith.extui %23 : i1 to i32
    %c0_i32_13 = arith.constant 0 : i32
    %25 = arith.cmpi ne, %24, %c0_i32_13 : i32
    scf.if %25 {
      %c0_14 = arith.constant 0 : index
      %c0_15 = arith.constant 0 : index
      %26 = vector.load %arg6[%c0_14, %c0_15] : memref<128x64xf32, #tpu.memory_space<vmem>>, vector<128x64xf32>
      %c0_16 = arith.constant 0 : index
      %c0_17 = arith.constant 0 : index
      %27 = vector.load %arg5[%c0_16, %c0_17] : memref<1x64xf32, #tpu.memory_space<vmem>>, vector<1x64xf32>
      %28 = vector.broadcast %27 : vector<1x64xf32> to vector<128x64xf32>
      %29 = arith.addf %26, %28 : vector<128x64xf32>
      %c0_18 = arith.constant 0 : index
      %c0_19 = arith.constant 0 : index
      %30 = vector.load %arg6[%c0_18, %c0_19] : memref<128x64xf32, #tpu.memory_space<vmem>>, vector<128x64xf32>
      tpu.vector_store %arg6[%c0_18, %c0_19], %29 {strides = array<i32>} : memref<128x64xf32, #tpu.memory_space<vmem>>, vector<128x64xf32>,
    } else {
    }
    return
  }
  func.func @transform_0(%arg0: i32) -> (i32, i32) {
    %c0_i32 = arith.constant 0 : i32
    %c0_i32_0 = arith.constant 0 : i32
    return %arg0, %c0_i32 : i32, i32
  }
  func.func @transform_1(%arg0: i32) -> (i32, i32) {
    %c0_i32 = arith.constant 0 : i32
    %c0_i32_0 = arith.constant 0 : i32
    return %arg0, %c0_i32 : i32, i32
  }
  func.func @transform_2(%arg0: i32) -> (i32, i32) {
    %c0_i32 = arith.constant 0 : i32
    %c0_i32_0 = arith.constant 0 : i32
    return %arg0, %c0_i32 : i32, i32
  }
  func.func @transform_3(%arg0: i32) -> (i32, i32) {
    %c0_i32 = arith.constant 0 : i32
    %c0_i32_0 = arith.constant 0 : i32
    %c0_i32_1 = arith.constant 0 : i32
    return %c0_i32, %c0_i32_0 : i32, i32
  }
  func.func @transform_4(%arg0: i32) -> (i32, i32) {
    %c0_i32 = arith.constant 0 : i32
    %c0_i32_0 = arith.constant 0 : i32
    %c0_i32_1 = arith.constant 0 : i32
    return %c0_i32, %c0_i32_0 : i32, i32
  }
  func.func @transform_5(%arg0: i32) -> (i32, i32) {
    %c0_i32 = arith.constant 0 : i32
    %c0_i32_0 = arith.constant 0 : i32
    %c0_i32_1 = arith.constant 0 : i32
    return %c0_i32, %c0_i32_0 : i32, i32
  }
}

module attributes {stable_mosaic.version = 11 : i64} {
  func.func @_linkx_dense_kernel(%arg0: i32, %arg1: memref<64x64xf32, #tpu.memory_space<vmem>>, %arg2: memref<64x32xf32, #tpu.memory_space<vmem>>, %arg3: memref<64x1xi32, #tpu.memory_space<vmem>>, %arg4: memref<10x8xf32, #tpu.memory_space<vmem>>, %arg5: memref<32x64xf32, #tpu.memory_space<vmem>>, %arg6: memref<8x64xf32, #tpu.memory_space<vmem>>, %arg7: memref<1x64xf32, #tpu.memory_space<vmem>>, %arg8: memref<64x64xf32, #tpu.memory_space<vmem>>, %arg9: memref<1x64xf32, #tpu.memory_space<vmem>>, %arg10: memref<64x64xf32, #tpu.memory_space<vmem>>, %arg11: memref<1x64xf32, #tpu.memory_space<vmem>>, %arg12: memref<64x16xf32, #tpu.memory_space<vmem>>, %arg13: memref<1x16xf32, #tpu.memory_space<vmem>>, %arg14: memref<64x16xf32, #tpu.memory_space<vmem>>) attributes {dimension_semantics = [#tpu.dimension_semantics<parallel>], iteration_bounds = array<i64: 2>, scalar_prefetch = 0 : i64, scratch_operands = 0 : i64, tpu.core_type = #tpu.core_type<tc>, window_params = [{transform_indices = @transform_0, window_bounds = array<i64: 64, 64>}, {transform_indices = @transform_1, window_bounds = array<i64: 64, 32>}, {transform_indices = @transform_2, window_bounds = array<i64: 64, 1>}, {pipeline_mode = #tpu.pipeline_mode<synchronous>, transform_indices = @transform_3, window_bounds = array<i64: 10, 8>}, {pipeline_mode = #tpu.pipeline_mode<synchronous>, transform_indices = @transform_4, window_bounds = array<i64: 32, 64>}, {pipeline_mode = #tpu.pipeline_mode<synchronous>, transform_indices = @transform_5, window_bounds = array<i64: 8, 64>}, {pipeline_mode = #tpu.pipeline_mode<synchronous>, transform_indices = @transform_6, window_bounds = array<i64: 1, 64>}, {pipeline_mode = #tpu.pipeline_mode<synchronous>, transform_indices = @transform_7, window_bounds = array<i64: 64, 64>}, {pipeline_mode = #tpu.pipeline_mode<synchronous>, transform_indices = @transform_8, window_bounds = array<i64: 1, 64>}, {pipeline_mode = #tpu.pipeline_mode<synchronous>, transform_indices = @transform_9, window_bounds = array<i64: 64, 64>}, {pipeline_mode = #tpu.pipeline_mode<synchronous>, transform_indices = @transform_10, window_bounds = array<i64: 1, 64>}, {pipeline_mode = #tpu.pipeline_mode<synchronous>, transform_indices = @transform_11, window_bounds = array<i64: 64, 16>}, {pipeline_mode = #tpu.pipeline_mode<synchronous>, transform_indices = @transform_12, window_bounds = array<i64: 1, 16>}, {transform_indices = @transform_13, window_bounds = array<i64: 64, 16>}]} {
    %c0 = arith.constant 0 : index
    %c0_0 = arith.constant 0 : index
    %0 = vector.load %arg1[%c0, %c0_0] : memref<64x64xf32, #tpu.memory_space<vmem>>, vector<64x64xf32>
    %c0_1 = arith.constant 0 : index
    %c0_2 = arith.constant 0 : index
    %1 = vector.load %arg8[%c0_1, %c0_2] : memref<64x64xf32, #tpu.memory_space<vmem>>, vector<64x64xf32>
    %cst = arith.constant dense<0.000000e+00> : vector<64x64xf32>
    %2 = tpu.matmul %0, %1, %cst {dimension_numbers = #tpu.dot_dimension_numbers<[1], [0], [0], [1], [0, 0, 1, 1], [], []>} : vector<64x64xf32>, vector<64x64xf32>, vector<64x64xf32> -> vector<64x64xf32>
    %3 = arith.addf %0, %2 : vector<64x64xf32>
    %c0_3 = arith.constant 0 : index
    %c0_4 = arith.constant 0 : index
    %4 = vector.load %arg9[%c0_3, %c0_4] : memref<1x64xf32, #tpu.memory_space<vmem>>, vector<1x64xf32>
    %5 = vector.broadcast %4 : vector<1x64xf32> to vector<64x64xf32>
    %6 = arith.addf %3, %5 : vector<64x64xf32>
    %c0_5 = arith.constant 0 : index
    %c0_6 = arith.constant 0 : index
    %7 = vector.load %arg3[%c0_5, %c0_6] : memref<64x1xi32, #tpu.memory_space<vmem>>, vector<64x1xi32>
    %8 = tpu.iota {dimensions = array<i32: 1>} : vector<64x10xi32>
    %9 = vector.broadcast %7 : vector<64x1xi32> to vector<64x10xi32>
    %10 = arith.cmpi eq, %8, %9 : vector<64x10xi32>
    %11 = arith.extui %10 : vector<64x10xi1> to vector<64x10xi32>
    %12 = arith.sitofp %11 : vector<64x10xi32> to vector<64x10xf32>
    %c0_7 = arith.constant 0 : index
    %c0_8 = arith.constant 0 : index
    %13 = vector.load %arg4[%c0_7, %c0_8] : memref<10x8xf32, #tpu.memory_space<vmem>>, vector<10x8xf32>
    %cst_9 = arith.constant dense<0.000000e+00> : vector<64x8xf32>
    %14 = tpu.matmul %12, %13, %cst_9 {dimension_numbers = #tpu.dot_dimension_numbers<[1], [0], [0], [1], [0, 0, 1, 1], [], []>} : vector<64x10xf32>, vector<10x8xf32>, vector<64x8xf32> -> vector<64x8xf32>
    %c0_10 = arith.constant 0 : index
    %c0_11 = arith.constant 0 : index
    %15 = vector.load %arg2[%c0_10, %c0_11] : memref<64x32xf32, #tpu.memory_space<vmem>>, vector<64x32xf32>
    %c0_12 = arith.constant 0 : index
    %c0_13 = arith.constant 0 : index
    %16 = vector.load %arg5[%c0_12, %c0_13] : memref<32x64xf32, #tpu.memory_space<vmem>>, vector<32x64xf32>
    %cst_14 = arith.constant dense<0.000000e+00> : vector<64x64xf32>
    %17 = tpu.matmul %15, %16, %cst_14 {dimension_numbers = #tpu.dot_dimension_numbers<[1], [0], [0], [1], [0, 0, 1, 1], [], []>} : vector<64x32xf32>, vector<32x64xf32>, vector<64x64xf32> -> vector<64x64xf32>
    %c0_15 = arith.constant 0 : index
    %c0_16 = arith.constant 0 : index
    %18 = vector.load %arg6[%c0_15, %c0_16] : memref<8x64xf32, #tpu.memory_space<vmem>>, vector<8x64xf32>
    %cst_17 = arith.constant dense<0.000000e+00> : vector<64x64xf32>
    %19 = tpu.matmul %14, %18, %cst_17 {dimension_numbers = #tpu.dot_dimension_numbers<[1], [0], [0], [1], [0, 0, 1, 1], [], []>} : vector<64x8xf32>, vector<8x64xf32>, vector<64x64xf32> -> vector<64x64xf32>
    %20 = arith.addf %17, %19 : vector<64x64xf32>
    %c0_18 = arith.constant 0 : index
    %c0_19 = arith.constant 0 : index
    %21 = vector.load %arg7[%c0_18, %c0_19] : memref<1x64xf32, #tpu.memory_space<vmem>>, vector<1x64xf32>
    %22 = vector.broadcast %21 : vector<1x64xf32> to vector<64x64xf32>
    %23 = arith.addf %20, %22 : vector<64x64xf32>
    %24 = arith.addf %6, %23 : vector<64x64xf32>
    %c0_20 = arith.constant 0 : index
    %c0_21 = arith.constant 0 : index
    %25 = vector.load %arg10[%c0_20, %c0_21] : memref<64x64xf32, #tpu.memory_space<vmem>>, vector<64x64xf32>
    %cst_22 = arith.constant dense<0.000000e+00> : vector<64x64xf32>
    %26 = tpu.matmul %23, %25, %cst_22 {dimension_numbers = #tpu.dot_dimension_numbers<[1], [0], [0], [1], [0, 0, 1, 1], [], []>} : vector<64x64xf32>, vector<64x64xf32>, vector<64x64xf32> -> vector<64x64xf32>
    %27 = arith.addf %24, %26 : vector<64x64xf32>
    %c0_23 = arith.constant 0 : index
    %c0_24 = arith.constant 0 : index
    %28 = vector.load %arg11[%c0_23, %c0_24] : memref<1x64xf32, #tpu.memory_space<vmem>>, vector<1x64xf32>
    %29 = vector.broadcast %28 : vector<1x64xf32> to vector<64x64xf32>
    %30 = arith.addf %27, %29 : vector<64x64xf32>
    %cst_25 = arith.constant 0.000000e+00 : f32
    %31 = vector.broadcast %cst_25 : f32 to vector<64x64xf32>
    %32 = arith.maximumf %30, %31 : vector<64x64xf32>
    %c0_26 = arith.constant 0 : index
    %c0_27 = arith.constant 0 : index
    %33 = vector.load %arg12[%c0_26, %c0_27] : memref<64x16xf32, #tpu.memory_space<vmem>>, vector<64x16xf32>
    %cst_28 = arith.constant dense<0.000000e+00> : vector<64x16xf32>
    %34 = tpu.matmul %32, %33, %cst_28 {dimension_numbers = #tpu.dot_dimension_numbers<[1], [0], [0], [1], [0, 0, 1, 1], [], []>} : vector<64x64xf32>, vector<64x16xf32>, vector<64x16xf32> -> vector<64x16xf32>
    %c0_29 = arith.constant 0 : index
    %c0_30 = arith.constant 0 : index
    %35 = vector.load %arg13[%c0_29, %c0_30] : memref<1x16xf32, #tpu.memory_space<vmem>>, vector<1x16xf32>
    %36 = vector.broadcast %35 : vector<1x16xf32> to vector<64x16xf32>
    %37 = arith.addf %34, %36 : vector<64x16xf32>
    %c0_31 = arith.constant 0 : index
    %c0_32 = arith.constant 0 : index
    %38 = vector.load %arg14[%c0_31, %c0_32] : memref<64x16xf32, #tpu.memory_space<vmem>>, vector<64x16xf32>
    tpu.vector_store %arg14[%c0_31, %c0_32], %37 {strides = array<i32>} : memref<64x16xf32, #tpu.memory_space<vmem>>, vector<64x16xf32>,
    return
  }
  func.func @transform_0(%arg0: i32) -> (i32, i32) {
    %c0_i32 = arith.constant 0 : i32
    %c0_i32_0 = arith.constant 0 : i32
    return %arg0, %c0_i32 : i32, i32
  }
  func.func @transform_1(%arg0: i32) -> (i32, i32) {
    %c0_i32 = arith.constant 0 : i32
    %c0_i32_0 = arith.constant 0 : i32
    return %arg0, %c0_i32 : i32, i32
  }
  func.func @transform_2(%arg0: i32) -> (i32, i32) {
    %c0_i32 = arith.constant 0 : i32
    %c0_i32_0 = arith.constant 0 : i32
    return %arg0, %c0_i32 : i32, i32
  }
  func.func @transform_3(%arg0: i32) -> (i32, i32) {
    %c0_i32 = arith.constant 0 : i32
    %c0_i32_0 = arith.constant 0 : i32
    %c0_i32_1 = arith.constant 0 : i32
    return %c0_i32, %c0_i32_0 : i32, i32
  }
  func.func @transform_4(%arg0: i32) -> (i32, i32) {
    %c0_i32 = arith.constant 0 : i32
    %c0_i32_0 = arith.constant 0 : i32
    %c0_i32_1 = arith.constant 0 : i32
    return %c0_i32, %c0_i32_0 : i32, i32
  }
  func.func @transform_5(%arg0: i32) -> (i32, i32) {
    %c0_i32 = arith.constant 0 : i32
    %c0_i32_0 = arith.constant 0 : i32
    %c0_i32_1 = arith.constant 0 : i32
    return %c0_i32, %c0_i32_0 : i32, i32
  }
  func.func @transform_6(%arg0: i32) -> (i32, i32) {
    %c0_i32 = arith.constant 0 : i32
    %c0_i32_0 = arith.constant 0 : i32
    %c0_i32_1 = arith.constant 0 : i32
    return %c0_i32, %c0_i32_0 : i32, i32
  }
  func.func @transform_7(%arg0: i32) -> (i32, i32) {
    %c0_i32 = arith.constant 0 : i32
    %c0_i32_0 = arith.constant 0 : i32
    %c0_i32_1 = arith.constant 0 : i32
    return %c0_i32, %c0_i32_0 : i32, i32
  }
  func.func @transform_8(%arg0: i32) -> (i32, i32) {
    %c0_i32 = arith.constant 0 : i32
    %c0_i32_0 = arith.constant 0 : i32
    %c0_i32_1 = arith.constant 0 : i32
    return %c0_i32, %c0_i32_0 : i32, i32
  }
  func.func @transform_9(%arg0: i32) -> (i32, i32) {
    %c0_i32 = arith.constant 0 : i32
    %c0_i32_0 = arith.constant 0 : i32
    %c0_i32_1 = arith.constant 0 : i32
    return %c0_i32, %c0_i32_0 : i32, i32
  }
  func.func @transform_10(%arg0: i32) -> (i32, i32) {
    %c0_i32 = arith.constant 0 : i32
    %c0_i32_0 = arith.constant 0 : i32
    %c0_i32_1 = arith.constant 0 : i32
    return %c0_i32, %c0_i32_0 : i32, i32
  }
  func.func @transform_11(%arg0: i32) -> (i32, i32) {
    %c0_i32 = arith.constant 0 : i32
    %c0_i32_0 = arith.constant 0 : i32
    %c0_i32_1 = arith.constant 0 : i32
    return %c0_i32, %c0_i32_0 : i32, i32
  }
  func.func @transform_12(%arg0: i32) -> (i32, i32) {
    %c0_i32 = arith.constant 0 : i32
    %c0_i32_0 = arith.constant 0 : i32
    %c0_i32_1 = arith.constant 0 : i32
    return %c0_i32, %c0_i32_0 : i32, i32
  }
  func.func @transform_13(%arg0: i32) -> (i32, i32) {
    %c0_i32 = arith.constant 0 : i32
    %c0_i32_0 = arith.constant 0 : i32
    return %arg0, %c0_i32 : i32, i32
  }
}

</mosaic_0001>

<bundles_post_ra>
// kernel: _linkx_wl_forward_impl.3
= control target key start
LH: loop header
LB: loop body
LE: loop exit
PB: predicated region body
PF: predicated region fallthrough
CT: control target
= control target key end

     0   :  { %s1324_s25 = smov 0   ;;  %s1617_s0 = inlined_call_operand.vmem [shape: f32[128,64], index: 0, kind: input, shape index: {}]   ;;  %s1618_s1 = inlined_call_operand.vmem [shape: f32[128,32], index: 1, kind: input, shape index: {}]   ;;  %s1619_s2 = inlined_call_operand.vmem [shape: s32[128,1], index: 2, kind: input, shape index: {}]   ;;  %s1620_s3 = inlined_call_operand.vmem [shape: f32[10,8], index: 3, kind: input, shape index: {}]   ;;  %s1621_s4 = inlined_call_operand.vmem [shape: f32[32,64], index: 4, kind: input, shape index: {}]   ;;  %s1622_s5 = inlined_call_operand.vmem [shape: f32[8,64], index: 5, kind: input, shape index: {}]   ;;  %s1623_s6 = inlined_call_operand.vmem [shape: f32[1,64], index: 6, kind: input, shape index: {}]   ;;  %s1624_s7 = inlined_call_operand.vmem [shape: f32[64,64], index: 7, kind: input, shape index: {}]   ;;  %s1625_s8 = inlined_call_operand.vmem [shape: f32[1,64], index: 8, kind: input, shape index: {}]   ;;  %s1626_s9 = inlined_call_operand.vmem [shape: f32[64,64], index: 9, kind: input, shape index: {}]   ;;  %s1627_s10 = inlined_call_operand.vmem [shape: f32[1,64], index: 10, kind: input, shape index: {}]   ;;  %s1628_s11 = inlined_call_operand.vmem [shape: f32[64,16], index: 11, kind: input, shape index: {}]   ;;  %s1629_s12 = inlined_call_operand.vmem [shape: f32[1,16], index: 12, kind: input, shape index: {}]   ;;  %s1630_s13 = inlined_call_operand.vmem [shape: f32[128,16], index: 13, kind: output, shape index: {}]  }
   0x1 LB: > { %s1152_s26 = sadd.s32 4294967295, %s1250_s25   ;;  %p1156_p0 = scmp.ge.s32.totalorder %s1250_s25, 1  ;;  %s1250_s25 = sphi %s1324_s25, %s23_s25  }
   0x2   : > { %p410_p1 = scmp.lt.s32.totalorder %s1250_s25, 3 }
   0x4   : > { %p411_p2 = pnand %p1156_p0, %p410_p1 }
   0x5   : > { %s1157_s27 = sshll.u32 (!%p411_p2), %s1152_s26, 3 }
   0x6   : > { %414 = sbr.rel (%p411_p2) target bundleno = 717 (0x2cd), region = 72  ;;  %p465_p3 = scmp.lt.s32.totalorder (!%p411_p2), %s1157_s27, 15 }
   0xb   : > { %v649_v0 = vld [vmem:[%s1620_s3 + $0x8] sm:$0x3]  ;;  %vm675_vm0 = vcmask 1041408   ;;  %v1252_v1 = vmov 0   ;;  %s1632_s27 = smov (!%p465_p3, %s1157_s27), 15  ;;  %v648_v10 = vld [vmem:[%s1620_s3] sm:$0xff]  ;;  %v598_v12 = vlaneseq }
   0xc   : > { %1238 = vset.pattern.permute.xlu1 %v1252_v1  ;;  %1237 = vset.pattern.permute.xlu0 %v1252_v1  ;;  %s1335_s30 = sshll.u32 %s1632_s27, 3  ;;  %vm650_vm2 = vcmask 80896   ;;  %v1253_v15 = vmov 0.0   ;;  %v503_v20 = vld [vmem:[%s1624_s7 + $0x38] sm:$0xff]  ;;  %v502_v21 = vld [vmem:[%s1624_s7 + $0x30] sm:$0xff]  ;;  %v501_v22 = vld [vmem:[%s1624_s7 + $0x28] sm:$0xff] }
   0xd   : > { %1239 = vset.pattern.permute.xlu2 %v1252_v1  ;;  %1181 = vmatpush.msk.msra.mxu1 %vm675_vm0, %v649_v0  ;;  %s480_s16 = scalar_lea.vmem %s1619_s2, %s1335_s30  ;;  %v1346_v13 = vand.u32 127, %v598_v12  ;;  %v732_v23 = vld [vmem:[%s1622_s5] sm:$0xff]  ;;  %v499_v26 = vld [vmem:[%s1624_s7 + $0x18] sm:$0xff]  ;;  %v498_v29 = vld [vmem:[%s1624_s7 + $0x10] sm:$0xff]  ;;  %s1383_s22 = scalar_lea.vmem %s1617_s0, %s1335_s30  ;;  %vm504_vm7 = vcmask 523264   ;;  %vm799_vm11 = vcmask 261120  }
   0xe   : > { %1224 = vmatpush.msk.msra.mxu3 %vm675_vm0, %v649_v0  ;;  %v592_v2 = vld [vmem:[%s480_s16 + $0x10] sm:$0xff]  ;;  %v590_v3 = vld [vmem:[%s480_s16] sm:$0xff]  ;;  %v593_v5 = vld [vmem:[%s480_s16 + $0x18] sm:$0xff]  ;;  %537 = vmatpush.msra.mxu0 %v503_v20  ;;  %s1429_s18 = scalar_lea.vmem %s1618_s1, %s1335_s30  ;;  %vm733_vm12 = vcmask 64512   ;;  %vm1063_vm13 = vcmask 130048  }
   0xf   : > { %607 = vperm.xlu1 %1238, %v592_v2   ;;  %601 = vperm.xlu0 %1237, %v590_v3   ;;  %v594_v4 = vld [vmem:[%s480_s16 + $0x20] sm:$0xff]  ;;  %v591_v6 = vld [vmem:[%s480_s16 + $0x8] sm:$0xff]  ;;  %v597_v8 = vld [vmem:[%s480_s16 + $0x38] sm:$0xff] }
  0x10   : > { %613 = vperm.xlu2 %1239, %v594_v4   ;;  %v595_v7 = vld [vmem:[%s480_s16 + $0x28] sm:$0xff]  ;;  %v596_v9 = vld [vmem:[%s480_s16 + $0x30] sm:$0xff]  ;;  %694 = vmatpush.msra.mxu1 %v648_v10  ;;  %v500_v24 = vld [vmem:[%s1624_s7 + $0x20] sm:$0xff] }
  0x11   : > { %1225 = vmatpush.msra.mxu3 %v648_v10  ;;  %538 = vmatpush.msra.mxu0 %v502_v21  ;;  %v497_v30 = vld [vmem:[%s1624_s7 + $0x8] sm:$0xff]  ;;  %v496_v31 = vld [vmem:[%s1624_s7] sm:$0xff]  ;;  %v731_v40 = vld [vmem:[%s1621_s4 + $0x18] sm:$0xff] }
  0x12   : > { %1226 = vmatpush.msra.mxu2 %v732_v23  ;;  %v1390_v34 = vld [vmem:[%s1383_s22] sm:$0xff]  ;;  %v1399_v37 = vld [vmem:[%s1383_s22 + $0x8] sm:$0xff]  ;;  %v730_v41 = vld [vmem:[%s1621_s4 + $0x10] sm:$0xff] }
  0x13   : > { %539 = vmatpush.msra.mxu0 %v501_v22  ;;  %836 = vmatpush.msrb.mxu3 %v731_v40  ;;  %v1414_v42 = vld [vmem:[%s1383_s22 + $0x10] sm:$0xff]  ;;  %v729_v44 = vld [vmem:[%s1621_s4 + $0x8] sm:$0xff]  ;;  %v1423_v45 = vld [vmem:[%s1383_s22 + $0x18] sm:$0xff] }
  0x14   : > { %v728_v46 = vld [vmem:[%s1621_s4] sm:$0xff]  ;;  %v1444_v49 = vld [vmem:[%s1383_s22 + $0x28] sm:$0xff]  ;;  %v1449_v50 = vld [vmem:[%s1383_s22 + $0x30] sm:$0xff] }
  0x15   : > { %540 = vmatpush.msra.mxu0 %v500_v24  ;;  %837 = vmatpush.msrb.mxu3 %v730_v41  ;;  %v720_v47 = vld [vmem:[%s1429_s18] sm:$0xff]  ;;  %v1454_v51 = vld [vmem:[%s1383_s22 + $0x38] sm:$0xff]  ;;  %v721_v52 = vld [vmem:[%s1429_s18 + $0x8] sm:$0xff] }
  0x16   : > { %v1439_v48 = vld [vmem:[%s1383_s22 + $0x20] sm:$0xff]  ;;  %v722_v53 = vld [vmem:[%s1429_s18 + $0x10] sm:$0xff]  ;;  %v723_v54 = vld [vmem:[%s1429_s18 + $0x18] sm:$0xff] }
  0x17   : > { %610 = vperm.xlu1 %1238, %v593_v5   ;;  %604 = vperm.xlu0 %1237, %v591_v6   ;;  %v724_v56 = vld [vmem:[%s1429_s18 + $0x20] sm:$0xff]  ;;  %v725_v58 = vld [vmem:[%s1429_s18 + $0x28] sm:$0xff]  ;;  %v726_v60 = vld [vmem:[%s1429_s18 + $0x30] sm:$0xff] }
  0x18   : > { %616 = vperm.xlu2 %1239, %v595_v7   ;;  %541 = vmatpush.msra.mxu0 %v499_v26  ;;  %v727_v62 = vld [vmem:[%s1429_s18 + $0x38] sm:$0xff]  ;;  %v891_v2 = vld [vmem:[%s1626_s9 + $0x30] sm:$0xff]  ;;  %v890_v3 = vld [vmem:[%s1626_s9 + $0x28] sm:$0xff]  ;;  %s486_s18 = scalar_lea.vmem %s1630_s13, %s1335_s30 }
  0x19   : > { %838 = vmatpush.msrb.mxu3 %v729_v44  ;;  %v892_v63 = vld [vmem:[%s1626_s9 + $0x38] sm:$0xff]  ;;  %v889_v4 = vld [vmem:[%s1626_s9 + $0x20] sm:$0xff] }
  0x1a   : > { %542 = vmatpush.msra.mxu0 %v498_v29  ;;  %925 = vmatpush.msrb.mxu2 %v892_v63  ;;  %v888_v5 = vld [vmem:[%s1626_s9 + $0x18] sm:$0xff]  ;;  %v1512_v21 = vld [vmem:[%s1625_s8] ss:$0 sm:$0xff] }
  0x1b   : > { %839 = vmatpush.msrb.mxu3 %v728_v46  ;;  %v1517_v22 = vld [vmem:[%s1623_s6] ss:$0 sm:$0xff] }
  0x1c   : > { %543 = vmatpush.msra.mxu0 %v497_v30  ;;  %926 = vmatpush.msrb.mxu2 %v891_v2 }
  0x1e   : > { %544 = vmatpush.msra.mxu0 %v496_v31  ;;  %927 = vmatpush.msrb.mxu2 %v890_v3 }
  0x1f   : > { %622 = vperm.xlu1 %1238, %v597_v8   ;;  %619 = vperm.xlu0 %1237, %v596_v9   ;;  %v887_v8 = vld [vmem:[%s1626_s9 + $0x10] sm:$0xff] }
  0x20   : > { %1165 = vmatmul.msk.f32.vlgmr.msra.gmra.mxu0 %vm504_vm7, %v1390_v34  ;;  %928 = vmatpush.msrb.mxu2 %v889_v4 }
  0x21   : > { %773 = vmatpush.msrb.mxu0 %v732_v23 }
  0x22   : > { %929 = vmatpush.msrb.mxu2 %v888_v5 }
  0x24   : > { %930 = vmatpush.msrb.mxu2 %v887_v8 }
  0x28   : > { %1166 = vmatmul.msk.f32.gmra.mxu0 %vm504_vm7, %v1399_v37 }
  0x30   : > { %1167 = vmatmul.msk.f32.gmra.mxu0 %vm504_vm7, %v1414_v42 }
  0x38   : > { %1168 = vmatmul.msk.f32.gmra.mxu0 %vm504_vm7, %v1423_v45 }
  0x40   : > { %1169 = vmatmul.msk.f32.gmra.mxu0 %vm504_vm7, %v1439_v48 }
  0x48   : > { %1170 = vmatmul.msk.f32.gmra.mxu0 %vm504_vm7, %v1444_v49 }
  0x50   : > { %1171 = vmatmul.msk.f32.gmra.mxu0 %vm504_vm7, %v1449_v50 }
  0x58   : > { %1172 = vmatmul.msk.f32.gmra.mxu0 %vm504_vm7, %v1454_v51 }
  0x6a   : > { %v1344_v11 = vpop.permute.xlu2 %613 }
  0x6b   : > { %vm628_vm10 = vcmp.eq.s32.totalorder %v1346_v13, %v1344_v11 }
  0x6c   : > { %v1177_v43 = vsel %vm628_vm10, 1.0, %v1253_v15 }
  0x72   : > { %v617_v14 = vpop.permute.xlu2 %616 }
  0x73   : > { %vm629_vm1 = vcmp.eq.s32.totalorder %v1346_v13, %v617_v14  ;;  %v886_v14 = vld [vmem:[%s1626_s9 + $0x8] sm:$0xff] }
  0x74   : > { %v1178_v16 = vsel %vm629_vm1, 1.0, %v1253_v15  ;;  %931 = vmatpush.msrb.mxu2 %v886_v14 }
  0x75   : > { %1187 = vmatmul.msk.f32.vlgmr.msra.gmra.mxu3 %vm650_vm2, %v1178_v16  ;;  %v885_v16 = vld [vmem:[%s1626_s9] sm:$0xff] }
  0x76   : > { %932 = vmatpush.msrb.mxu2 %v885_v16 }
  0x81   : > { %v608_v17 = vpop.permute.xlu1 %607  ;;  %v602_v18 = vpop.permute.xlu0 %601 }
  0x82   : > { %vm624_vm3 = vcmp.eq.s32.totalorder %v1346_v13, %v602_v18  ;;  %vm626_vm5 = vcmp.eq.s32.totalorder %v1346_v13, %v608_v17 }
  0x83   : > { %v1173_v19 = vsel %vm624_vm3, 1.0, %v1253_v15  ;;  %v1175_v32 = vsel %vm626_vm5, 1.0, %v1253_v15 }
  0x84   : > { %1182 = vmatmul.msk.f32.vlgmr.msra.gmra.mxu1 %vm650_vm2, %v1173_v19 }
  0x89   : > { %v605_v25 = vpop.permute.xlu0 %604  ;;  %v611_v27 = vpop.permute.xlu1 %610 }
  0x8a   : > { %vm625_vm4 = vcmp.eq.s32.totalorder %v1346_v13, %v605_v25  ;;  %vm627_vm8 = vcmp.eq.s32.totalorder %v1346_v13, %v611_v27 }
  0x8b   : > { %v1174_v28 = vsel %vm625_vm4, 1.0, %v1253_v15  ;;  %v1176_v38 = vsel %vm627_vm8, 1.0, %v1253_v15 }
  0x8c   : > { %1183 = vmatmul.msk.f32.gmra.mxu1 %vm650_vm2, %v1174_v28 }
  0x91   : > { %v620_v33 = vpop.permute.xlu0 %619  ;;  %v623_v36 = vpop.permute.xlu1 %622 }
  0x92   : > { %vm630_vm6 = vcmp.eq.s32.totalorder %v1346_v13, %v620_v33  ;;  %vm631_vm9 = vcmp.eq.s32.totalorder %v1346_v13, %v623_v36 }
  0x93   : > { %v1179_v35 = vsel %vm630_vm6, 1.0, %v1253_v15  ;;  %v1180_v39 = vsel %vm631_vm9, 1.0, %v1253_v15 }
  0x94   : > { %1184 = vmatmul.msk.f32.gmra.mxu1 %vm650_vm2, %v1175_v32  ;;  %1188 = vmatmul.msk.f32.gmra.mxu3 %vm650_vm2, %v1179_v35 }
  0x9c   : > { %1185 = vmatmul.msk.f32.gmra.mxu1 %vm650_vm2, %v1176_v38  ;;  %1189 = vmatmul.msk.f32.gmra.mxu3 %vm650_vm2, %v1180_v39 }
  0x9d   : > { %v546_v7 = vpop.f32.mrf.mxu0 }
  0x9e   : > { %v570_v20 = vadd.f32 %v546_v7, %v1390_v34 }
  0xa0   : > { %v582_v26 = vadd.f32 %v1512_v21, %v570_v20 }
  0xa4   : > { %1186 = vmatmul.msk.f32.gmra.mxu1 %vm650_vm2, %v1177_v43  ;;  %1198 = vmatmul.msk.f32.vlgmr.msrb.gmra.mxu3 %vm799_vm11, %v720_v47 }
  0xa5   : > { %v549_v10 = vpop.f32.mrf.mxu0 }
  0xa6   : > { %v571_v29 = vadd.f32 %v549_v10, %v1399_v37 }
  0xa8   : > { %v583_v32 = vadd.f32 %v1512_v21, %v571_v29 }
  0xac   : > { %1199 = vmatmul.msk.f32.gmra.mxu3 %vm799_vm11, %v721_v52 }
  0xad   : > { %v552_v11 = vpop.f32.mrf.mxu0 }
  0xae   : > { %v572_v36 = vadd.f32 %v552_v11, %v1414_v42 }
  0xb0   : > { %v584_v40 = vadd.f32 %v1512_v21, %v572_v36 }
  0xb4   : > { %1200 = vmatmul.msk.f32.gmra.mxu3 %vm799_vm11, %v722_v53 }
  0xb5   : > { %v555_v12 = vpop.f32.mrf.mxu0 }
  0xb6   : > { %v573_v44 = vadd.f32 %v555_v12, %v1423_v45 }
  0xb8   : > { %v585_v53 = vadd.f32 %v1512_v21, %v573_v44 }
  0xbc   : > { %1201 = vmatmul.msk.f32.gmra.mxu3 %vm799_vm11, %v723_v54  ;;  %v993_v54 = vld [vmem:[%s1628_s11 + $0x38] sm:$0xff] }
  0xbd   : > { %v558_v13 = vpop.f32.mrf.mxu0  ;;  %1030 = vmatpush.msrb.mxu1 %v993_v54 }
  0xbe   : > { %v574_v45 = vadd.f32 %v558_v13, %v1439_v48  ;;  %v989_v48 = vld [vmem:[%s1628_s11 + $0x18] sm:$0xff] }
  0xc4   : > { %1202 = vmatmul.msk.f32.gmra.mxu3 %vm799_vm11, %v724_v56 }
  0xc5   : > { %v561_v15 = vpop.f32.mrf.mxu0 }
  0xc6   : > { %v575_v2 = vadd.f32 %v561_v15, %v1444_v49 }
  0xc8   : > { %v587_v5 = vadd.f32 %v1512_v21, %v575_v2 }
  0xcc   : > { %1203 = vmatmul.msk.f32.gmra.mxu3 %vm799_vm11, %v725_v58 }
  0xcd   : > { %v1504_v17 = vpop.f32.mrf.mxu0 }
  0xd4   : > { %1204 = vmatmul.msk.f32.gmra.mxu3 %vm799_vm11, %v726_v60  ;;  %v990_v60 = vld [vmem:[%s1628_s11 + $0x20] sm:$0xff] }
  0xd5   : > { %v1506_v18 = vpop.f32.mrf.mxu0 }
  0xd6   : > { %v577_v15 = vadd.f32 %v1506_v18, %v1454_v51  ;;  %v1242_v51 = vld [vmem:[%s1627_s10] ss:$0 sm:$0xff] }
  0xd8   : > { %v589_v20 = vadd.f32 %v1512_v21, %v577_v15 }
  0xdc   : > { %1205 = vmatmul.msk.f32.gmra.mxu3 %vm799_vm11, %v727_v62  ;;  %v586_v62 = vadd.f32 %v1512_v21, %v574_v45 }
  0xf8   : > { %v711_v1 = vpop.f32.mrf.mxu3 }
 0x101   : > { %v696_v55 = vpop.f32.mrf.mxu1 }
 0x102   : > { %1190 = vmatmul.msk.f32.vlgmr.msrb.gmra.mxu0 %vm733_vm12, %v696_v55  ;;  %v992_v55 = vld [vmem:[%s1628_s11 + $0x30] sm:$0xff] }
 0x103   : > { %1031 = vmatpush.msrb.mxu1 %v992_v55 }
 0x109   : > { %v699_v57 = vpop.f32.mrf.mxu1 }
 0x10a   : > { %1191 = vmatmul.msk.f32.gmra.mxu0 %vm733_vm12, %v699_v57  ;;  %v991_v57 = vld [vmem:[%s1628_s11 + $0x28] sm:$0xff] }
 0x10b   : > { %1032 = vmatpush.msrb.mxu1 %v991_v57 }
 0x10d   : > { %1033 = vmatpush.msrb.mxu1 %v990_v60 }
 0x10f   : > { %1034 = vmatpush.msrb.mxu1 %v989_v48 }
 0x111   : > { %v702_v59 = vpop.f32.mrf.mxu1 }
 0x112   : > { %1192 = vmatmul.msk.f32.gmra.mxu0 %vm733_vm12, %v702_v59 }
 0x117   : > { %v714_v6 = vpop.f32.mrf.mxu3 }
 0x119   : > { %v705_v61 = vpop.f32.mrf.mxu1 }
 0x11a   : > { %1193 = vmatmul.msk.f32.vlgmr.msra.gmra.mxu2 %vm733_vm12, %v705_v61 }
 0x11f   : > { %v717_v9 = vpop.f32.mrf.mxu3 }
 0x121   : > { %v708_v0 = vpop.f32.mrf.mxu1 }
 0x122   : > { %1194 = vmatmul.msk.f32.gmra.mxu2 %vm733_vm12, %v708_v0  ;;  %v988_v0 = vld [vmem:[%s1628_s11 + $0x10] sm:$0xff] }
 0x123   : > { %1035 = vmatpush.msrb.mxu1 %v988_v0 }
 0x127   : > { %v841_v19 = vpop.f32.mrf.mxu3 }
 0x12a   : > { %1195 = vmatmul.msk.f32.gmra.mxu2 %vm733_vm12, %v711_v1 }
 0x12f   : > { %v844_v25 = vpop.f32.mrf.mxu3 }
 0x132   : > { %1196 = vmatmul.msk.f32.gmra.mxu2 %vm733_vm12, %v714_v6 }
 0x137   : > { %v847_v34 = vpop.f32.mrf.mxu3 }
 0x13a   : > { %1197 = vmatmul.msk.f32.gmra.mxu2 %vm733_vm12, %v717_v9  ;;  %v576_v9 = vadd.f32 %v1504_v17, %v1449_v50  ;;  %v987_v17 = vld [vmem:[%s1628_s11 + $0x8] sm:$0xff] }
 0x13b   : > { %1036 = vmatpush.msrb.mxu1 %v987_v17 }
 0x13c   : > { %v588_v12 = vadd.f32 %v1512_v21, %v576_v9 }
 0x13f   : > { %v850_v37 = vpop.f32.mrf.mxu3 }
 0x147   : > { %v853_v47 = vpop.f32.mrf.mxu3 }
 0x14f   : > { %v856_v61 = vpop.f32.mrf.mxu3 }
 0x157   : > { %v859_v7 = vpop.f32.mrf.mxu3 }
 0x15f   : > { %v862_v14 = vpop.f32.mrf.mxu3 }
 0x17f   : > { %v775_v23 = vpop.f32.mrf.mxu0 }
 0x180   : > { %v842_v24 = vadd.f32 %v841_v19, %v775_v23 }
 0x182   : > { %v869_v27 = vadd.f32 %v1517_v22, %v842_v24  ;;  %v986_v24 = vld [vmem:[%s1628_s11] sm:$0xff] }
 0x183   : > { %1037 = vmatpush.msrb.mxu1 %v986_v24 }
 0x184   : > { %1206 = vmatmul.msk.f32.vlgmr.msrb.gmra.mxu2 %vm504_vm7, %v869_v27  ;;  %v1522_v28 = vadd.f32 %v869_v27, %v582_v26 }
 0x187   : > { %v778_v30 = vpop.f32.mrf.mxu0 }
 0x188   : > { %v845_v31 = vadd.f32 %v844_v25, %v778_v30 }
 0x18a   : > { %v870_v33 = vadd.f32 %v1517_v22, %v845_v31 }
 0x18c   : > { %1207 = vmatmul.msk.f32.gmra.mxu2 %vm504_vm7, %v870_v33  ;;  %v1528_v35 = vadd.f32 %v870_v33, %v583_v32 }
 0x18f   : > { %v781_v38 = vpop.f32.mrf.mxu0 }
 0x190   : > { %v848_v39 = vadd.f32 %v847_v34, %v781_v38 }
 0x192   : > { %v871_v41 = vadd.f32 %v1517_v22, %v848_v39 }
 0x194   : > { %1208 = vmatmul.msk.f32.gmra.mxu2 %vm504_vm7, %v871_v41  ;;  %v1534_v43 = vadd.f32 %v871_v41, %v584_v40 }
 0x19d   : > { %v784_v46 = vpop.f32.mrf.mxu2 }
 0x19e   : > { %v851_v52 = vadd.f32 %v850_v37, %v784_v46 }
 0x1a0   : > { %v872_v42 = vadd.f32 %v1517_v22, %v851_v52 }
 0x1a2   : > { %1209 = vmatmul.msk.f32.gmra.mxu2 %vm504_vm7, %v872_v42  ;;  %v1546_v56 = vadd.f32 %v872_v42, %v585_v53 }
 0x1a5   : > { %v787_v58 = vpop.f32.mrf.mxu2 }
 0x1a6   : > { %v854_v59 = vadd.f32 %v853_v47, %v787_v58  ;;  %v1243_v58 = vld [vmem:[%s1629_s12] ss:$0 sm:$0xff] }
 0x1a8   : > { %v873_v63 = vadd.f32 %v1517_v22, %v854_v59 }
 0x1aa   : > { %1210 = vmatmul.msk.f32.gmra.mxu2 %vm504_vm7, %v873_v63  ;;  %v881_v1 = vadd.f32 %v873_v63, %v586_v62 }
 0x1ad   : > { %v790_v3 = vpop.f32.mrf.mxu2 }
 0x1ae   : > { %v857_v4 = vadd.f32 %v856_v61, %v790_v3 }
 0x1b0   : > { %v874_v6 = vadd.f32 %v1517_v22, %v857_v4 }
 0x1b2   : > { %1211 = vmatmul.msk.f32.gmra.mxu2 %vm504_vm7, %v874_v6  ;;  %v882_v8 = vadd.f32 %v874_v6, %v587_v5 }
 0x1b5   : > { %v793_v10 = vpop.f32.mrf.mxu2 }
 0x1b6   : > { %v860_v11 = vadd.f32 %v859_v7, %v793_v10 }
 0x1b8   : > { %v875_v49 = vadd.f32 %v1517_v22, %v860_v11 }
 0x1ba   : > { %1212 = vmatmul.msk.f32.gmra.mxu2 %vm504_vm7, %v875_v49  ;;  %v883_v13 = vadd.f32 %v875_v49, %v588_v12 }
 0x1bd   : > { %v796_v16 = vpop.f32.mrf.mxu2 }
 0x1be   : > { %v863_v19 = vadd.f32 %v862_v14, %v796_v16 }
 0x1c0   : > { %v876_v23 = vadd.f32 %v1517_v22, %v863_v19 }
 0x1c2   : > { %1213 = vmatmul.msk.f32.gmra.mxu2 %vm504_vm7, %v876_v23  ;;  %v884_v50 = vadd.f32 %v876_v23, %v589_v20 }
 0x207   : > { %v934_v18 = vpop.f32.mrf.mxu2 }
 0x208   : > { %v958_v21 = vadd.f32 %v934_v18, %v1522_v28 }
 0x20a   : > { %v970_v22 = vadd.f32 %v1242_v51, %v958_v21 }
 0x20c   : > { %v978_v25 = vmax.f32 %v970_v22, 0.0 }
 0x20e   : > { %1214 = vmatmul.msk.f32.vlgmr.msrb.gmra.mxu1 %vm504_vm7, %v978_v25 }
 0x20f   : > { %v937_v26 = vpop.f32.mrf.mxu2 }
 0x210   : > { %v959_v27 = vadd.f32 %v937_v26, %v1528_v35 }
 0x212   : > { %v971_v29 = vadd.f32 %v1242_v51, %v959_v27 }
 0x214   : > { %v979_v30 = vmax.f32 %v971_v29, 0.0 }
 0x216   : > { %1215 = vmatmul.msk.f32.gmra.mxu1 %vm504_vm7, %v979_v30 }
 0x217   : > { %v940_v31 = vpop.f32.mrf.mxu2 }
 0x218   : > { %v960_v32 = vadd.f32 %v940_v31, %v1534_v43 }
 0x21a   : > { %v972_v33 = vadd.f32 %v1242_v51, %v960_v32 }
 0x21c   : > { %v980_v34 = vmax.f32 %v972_v33, 0.0 }
 0x21e   : > { %1216 = vmatmul.msk.f32.gmra.mxu1 %vm504_vm7, %v980_v34 }
 0x225   : > { %v943_v36 = vpop.f32.mrf.mxu2 }
 0x226   : > { %v961_v28 = vadd.f32 %v943_v36, %v1546_v56 }
 0x228   : > { %v973_v38 = vadd.f32 %v1242_v51, %v961_v28 }
 0x22a   : > { %v981_v39 = vmax.f32 %v973_v38, 0.0 }
 0x22c   : > { %1217 = vmatmul.msk.f32.gmra.mxu1 %vm504_vm7, %v981_v39 }
 0x22d   : > { %v946_v40 = vpop.f32.mrf.mxu2 }
 0x22e   : > { %v962_v35 = vadd.f32 %v946_v40, %v881_v1 }
 0x230   : > { %v974_v41 = vadd.f32 %v1242_v51, %v962_v35 }
 0x232   : > { %v982_v37 = vmax.f32 %v974_v41, 0.0 }
 0x234   : > { %1218 = vmatmul.msk.f32.gmra.mxu1 %vm504_vm7, %v982_v37 }
 0x235   : > { %v949_v44 = vpop.f32.mrf.mxu2 }
 0x236   : > { %v963_v43 = vadd.f32 %v949_v44, %v882_v8 }
 0x238   : > { %v975_v46 = vadd.f32 %v1242_v51, %v963_v43 }
 0x23a   : > { %v983_v47 = vmax.f32 %v975_v46, 0.0 }
 0x23c   : > { %1219 = vmatmul.msk.f32.gmra.mxu1 %vm504_vm7, %v983_v47 }
 0x23d   : > { %v952_v52 = vpop.f32.mrf.mxu2 }
 0x23e   : > { %v964_v53 = vadd.f32 %v952_v52, %v883_v13 }
 0x240   : > { %v976_v42 = vadd.f32 %v1242_v51, %v964_v53 }
 0x242   : > { %v984_v54 = vmax.f32 %v976_v42, 0.0 }
 0x244   : > { %1220 = vmatmul.msk.f32.gmra.mxu1 %vm504_vm7, %v984_v54 }
 0x245   : > { %v955_v55 = vpop.f32.mrf.mxu2 }
 0x246   : > { %v965_v56 = vadd.f32 %v955_v55, %v884_v50 }
 0x248   : > { %v977_v45 = vadd.f32 %v1242_v51, %v965_v56 }
 0x24a   : > { %v985_v57 = vmax.f32 %v977_v45, 0.0 }
 0x24c   : > { %1221 = vmatmul.msk.f32.gmra.mxu1 %vm504_vm7, %v985_v57 }
 0x28b   : > { %v1039_v59 = vpop.f32.mrf.mxu1 }
 0x28c   : > { %v1040_v60 = vadd.f32 %v1243_v58, %v1039_v59 }
 0x28e   : > { %1064 = vst.msk [vmem:[%s486_s18] sm:$0xff] %vm1063_vm13, %v1040_v60 }
 0x293   : > { %v1042_v61 = vpop.f32.mrf.mxu1 }
 0x294   : > { %v1043_v62 = vadd.f32 %v1243_v58, %v1042_v61 }
 0x296   : > { %1065 = vst.msk [vmem:[%s486_s18 + $0x8] sm:$0xff] %vm1063_vm13, %v1043_v62 }
 0x29b   : > { %v1045_v63 = vpop.f32.mrf.mxu1 }
 0x29c   : > { %v1046_v48 = vadd.f32 %v1243_v58, %v1045_v63 }
 0x29e   : > { %1066 = vst.msk [vmem:[%s486_s18 + $0x10] sm:$0xff] %vm1063_vm13, %v1046_v48 }
 0x2a9   : > { %v1048_v0 = vpop.f32.mrf.mxu1 }
 0x2aa   : > { %v1049_v1 = vadd.f32 %v1243_v58, %v1048_v0 }
 0x2ac   : > { %1067 = vst.msk [vmem:[%s486_s18 + $0x18] sm:$0xff] %vm1063_vm13, %v1049_v1 }
 0x2b1   : > { %v1051_v2 = vpop.f32.mrf.mxu1 }
 0x2b2   : > { %v1052_v3 = vadd.f32 %v1243_v58, %v1051_v2 }
 0x2b4   : > { %1068 = vst.msk [vmem:[%s486_s18 + $0x20] sm:$0xff] %vm1063_vm13, %v1052_v3 }
 0x2b9   : > { %v1054_v4 = vpop.f32.mrf.mxu1 }
 0x2ba   : > { %v1055_v5 = vadd.f32 %v1243_v58, %v1054_v4 }
 0x2bc   : > { %1069 = vst.msk [vmem:[%s486_s18 + $0x28] sm:$0xff] %vm1063_vm13, %v1055_v5 }
 0x2c1   : > { %v1057_v6 = vpop.f32.mrf.mxu1 }
 0x2c2   : > { %v1058_v7 = vadd.f32 %v1243_v58, %v1057_v6 }
 0x2c4   : > { %1070 = vst.msk [vmem:[%s486_s18 + $0x30] sm:$0xff] %vm1063_vm13, %v1058_v7 }
 0x2c9   : > { %v1060_v8 = vpop.f32.mrf.mxu1 }
 0x2ca   : > { %v1061_v9 = vadd.f32 %v1243_v58, %v1060_v8 }
 0x2cc   : > { %1071 = vst.msk [vmem:[%s486_s18 + $0x38] sm:$0xff] %vm1063_vm13, %v1061_v9 }
 0x2cd PF: > { %s23_s25 = sadd.s32 1, %s1250_s25  }
 0x2ce   : > { %p20_p4 = scmp.ge.s32.totalorder %s23_s25, 4  }
 0x2d0   :  { %22 = sbr.rel (!%p20_p4) target bundleno = 1 (0x1), region = 108 }

// kernel: _linkx_wl_forward_impl.2
= control target key start
LH: loop header
LB: loop body
LE: loop exit
PB: predicated region body
PF: predicated region fallthrough
CT: control target
= control target key end

     0   :  { %s1102_s18 = smov 0   ;;  %s1595_s0 = inlined_call_operand.vmem [shape: s32[512,1], index: 0, kind: input, shape index: {}]   ;;  %s1596_s1 = inlined_call_operand.vmem [shape: s32[512,1], index: 1, kind: input, shape index: {}]   ;;  %s1597_s2 = inlined_call_operand.vmem [shape: f32[512,1], index: 2, kind: input, shape index: {}]   ;;  %s1598_s3 = inlined_call_operand.vmem [shape: f32[128,64], index: 3, kind: input, shape index: {}]   ;;  %s1599_s4 = inlined_call_operand.vmem [shape: f32[1,64], index: 4, kind: input, shape index: {}]   ;;  %s1600_s5 = inlined_call_operand.vmem [shape: f32[128,64], index: 5, kind: output, shape index: {}]  }
   0x1 LB: > { %s1108_s19 = sadd.s32 4294967295, %s1066_s18   ;;  %p953_p0 = scmp.ge.s32.totalorder %s1066_s18, 1  ;;  %s1066_s18 = sphi %s1102_s18, %s15_s18  }
   0x2   : > { %p205_p1 = scmp.lt.s32.totalorder %s1066_s18, 5 }
   0x4   : > { %p206_p2 = pnand %p953_p0, %p205_p1 }
   0x5   : > { %s954_s20 = sshll.u32 (!%p206_p2), %s1108_s19, 4  ;;  %p960_p4 = scmp.ne.s32.totalorder (!%p206_p2), %s1108_s19, 0 }
   0x6   : > { %209 = sbr.rel (%p206_p2) target bundleno = 633 (0x279), region = 40  ;;  %p239_p3 = scmp.lt.s32.totalorder (!%p206_p2), %s954_s20, 63 }
   0xb   : > { %s1602_s20 = smov (!%p239_p3, %s954_s20), 63  ;;  %259 = sbr.rel (%p960_p4) target bundleno = 33 (0x21), region = 44 }
   0xc   : > { %s955_s21 = sshll.u32 %s1602_s20, 3 }
   0xd   : > { %s1116_s24 = scalar_lea.vmem %s1595_s0, %s955_s21  ;;  %s1121_s27 = scalar_lea.vmem %s1596_s1, %s955_s21 }
   0xe   : > { %s1126_s30 = scalar_lea.vmem %s1597_s2, %s955_s21 }
  0x10   : > { %vm260_vm0 = vcmask 523264   ;;  %v1068_v0 = vmov 0.0  }
  0x11   : > { %261 = vst.msk [vmem:[%s1600_s5] sm:$0xff] %vm260_vm0, %v1068_v0 }
  0x12   : > { %262 = vst.msk [vmem:[%s1600_s5 + $0x8] sm:$0xff] %vm260_vm0, %v1068_v0 }
  0x13   : > { %263 = vst.msk [vmem:[%s1600_s5 + $0x10] sm:$0xff] %vm260_vm0, %v1068_v0 }
  0x14   : > { %264 = vst.msk [vmem:[%s1600_s5 + $0x18] sm:$0xff] %vm260_vm0, %v1068_v0 }
  0x15   : > { %265 = vst.msk [vmem:[%s1600_s5 + $0x20] sm:$0xff] %vm260_vm0, %v1068_v0 }
  0x16   : > { %266 = vst.msk [vmem:[%s1600_s5 + $0x28] sm:$0xff] %vm260_vm0, %v1068_v0 }
  0x17   : > { %267 = vst.msk [vmem:[%s1600_s5 + $0x30] sm:$0xff] %vm260_vm0, %v1068_v0 }
  0x18   : > { %268 = vst.msk [vmem:[%s1600_s5 + $0x38] sm:$0xff] %vm260_vm0, %v1068_v0 }
  0x19   : > { %269 = vst.msk [vmem:[%s1600_s5 + $0x40] sm:$0xff] %vm260_vm0, %v1068_v0 }
  0x1a   : > { %270 = vst.msk [vmem:[%s1600_s5 + $0x48] sm:$0xff] %vm260_vm0, %v1068_v0 }
  0x1b   : > { %271 = vst.msk [vmem:[%s1600_s5 + $0x50] sm:$0xff] %vm260_vm0, %v1068_v0 }
  0x1c   : > { %272 = vst.msk [vmem:[%s1600_s5 + $0x58] sm:$0xff] %vm260_vm0, %v1068_v0 }
  0x1d   : > { %273 = vst.msk [vmem:[%s1600_s5 + $0x60] sm:$0xff] %vm260_vm0, %v1068_v0 }
  0x1e   : > { %274 = vst.msk [vmem:[%s1600_s5 + $0x68] sm:$0xff] %vm260_vm0, %v1068_v0 }
  0x1f   : > { %275 = vst.msk [vmem:[%s1600_s5 + $0x70] sm:$0xff] %vm260_vm0, %v1068_v0 }
  0x20   : > { %276 = vst.msk [vmem:[%s1600_s5 + $0x78] sm:$0xff] %vm260_vm0, %v1068_v0 }
  0x21 PF: > { %v288_v1 = vld [vmem:[%s1116_s24 + $0x58] sm:$0xff]  ;;  %v287_v2 = vld [vmem:[%s1116_s24 + $0x50] sm:$0xff]  ;;  %v285_v3 = vld [vmem:[%s1116_s24 + $0x40] sm:$0xff]  ;;  %v1069_v4 = vmov 0   ;;  %v325_v60 = vlaneseq  ;;  %p1009_p5 = scmp.ne.s32.totalorder %s1108_s19, 3 }
  0x22   : > { %1058 = vset.pattern.permute.xlu2 %v1069_v4  ;;  %1057 = vset.pattern.permute.xlu1 %v1069_v4  ;;  %v278_v5 = vld [vmem:[%s1116_s24 + $0x8] sm:$0xff]  ;;  %v277_v7 = vld [vmem:[%s1116_s24] sm:$0xff]  ;;  %v279_v10 = vld [vmem:[%s1116_s24 + $0x10] sm:$0xff] }
  0x23   : > { %1056 = vset.pattern.permute.xlu0 %v1069_v4  ;;  %361 = vperm.xlu2 %1058, %v288_v1   ;;  %v286_v6 = vld [vmem:[%s1116_s24 + $0x48] sm:$0xff]  ;;  %v289_v9 = vld [vmem:[%s1116_s24 + $0x60] sm:$0xff]  ;;  %v280_v12 = vld [vmem:[%s1116_s24 + $0x18] sm:$0xff]  ;;  %v1286_v1 = vand.u32 127, %v325_v60  ;;  %v1070_v4 = vmov 1.0  }
  0x24   : > { %358 = vperm.xlu1 %1057, %v287_v2   ;;  %352 = vperm.xlu0 %1056, %v285_v3   ;;  %v290_v8 = vld [vmem:[%s1116_s24 + $0x68] sm:$0xff]  ;;  %v281_v11 = vld [vmem:[%s1116_s24 + $0x20] sm:$0xff]  ;;  %v291_v13 = vld [vmem:[%s1116_s24 + $0x70] sm:$0xff] }
  0x25   : > { %v283_v14 = vld [vmem:[%s1116_s24 + $0x30] sm:$0xff]  ;;  %v292_v15 = vld [vmem:[%s1116_s24 + $0x78] sm:$0xff]  ;;  %v282_v16 = vld [vmem:[%s1116_s24 + $0x28] sm:$0xff] }
  0x26   : > { %v294_v17 = vld [vmem:[%s1121_s27 + $0x8] sm:$0xff]  ;;  %v284_v18 = vld [vmem:[%s1116_s24 + $0x38] sm:$0xff]  ;;  %v293_v19 = vld [vmem:[%s1121_s27] sm:$0xff] }
  0x27   : > { %v297_v20 = vld [vmem:[%s1121_s27 + $0x20] sm:$0xff]  ;;  %v295_v21 = vld [vmem:[%s1121_s27 + $0x10] sm:$0xff]  ;;  %v296_v22 = vld [vmem:[%s1121_s27 + $0x18] sm:$0xff] }
  0x28   : > { %v534_v23 = vld [vmem:[%s1598_s3 + $0x78] sm:$0xff]  ;;  %v533_v24 = vld [vmem:[%s1598_s3 + $0x70] sm:$0xff]  ;;  %v298_v26 = vld [vmem:[%s1121_s27 + $0x28] sm:$0xff] }
  0x29   : > { %1012 = vmatpush.msra.mxu2 %v534_v23  ;;  %535 = vmatpush.msra.mxu0 %v534_v23  ;;  %v300_v25 = vld [vmem:[%s1121_s27 + $0x38] sm:$0xff]  ;;  %v299_v27 = vld [vmem:[%s1121_s27 + $0x30] sm:$0xff]  ;;  %v532_v28 = vld [vmem:[%s1598_s3 + $0x68] sm:$0xff] }
  0x2a   : > { %v531_v29 = vld [vmem:[%s1598_s3 + $0x60] sm:$0xff]  ;;  %v530_v30 = vld [vmem:[%s1598_s3 + $0x58] sm:$0xff]  ;;  %v303_v31 = vld [vmem:[%s1121_s27 + $0x50] sm:$0xff] }
  0x2b   : > { %331 = vperm.xlu2 %1058, %v278_v5   ;;  %1013 = vmatpush.msra.mxu2 %v533_v24  ;;  %v529_v32 = vld [vmem:[%s1598_s3 + $0x50] sm:$0xff]  ;;  %v301_v33 = vld [vmem:[%s1121_s27 + $0x40] sm:$0xff]  ;;  %v302_v34 = vld [vmem:[%s1121_s27 + $0x48] sm:$0xff] }
  0x2c   : > { %355 = vperm.xlu0 %1056, %v286_v6   ;;  %328 = vperm.xlu1 %1057, %v277_v7   ;;  %v528_v35 = vld [vmem:[%s1598_s3 + $0x48] sm:$0xff]  ;;  %v527_v36 = vld [vmem:[%s1598_s3 + $0x40] sm:$0xff]  ;;  %v526_v37 = vld [vmem:[%s1598_s3 + $0x38] sm:$0xff] }
  0x2d   : > { %536 = vmatpush.msra.mxu0 %v533_v24  ;;  %1014 = vmatpush.msra.mxu2 %v532_v28  ;;  %v306_v38 = vld [vmem:[%s1121_s27 + $0x68] sm:$0xff]  ;;  %v525_v39 = vld [vmem:[%s1598_s3 + $0x30] sm:$0xff]  ;;  %v304_v40 = vld [vmem:[%s1121_s27 + $0x58] sm:$0xff] }
  0x2e   : > { %v305_v41 = vld [vmem:[%s1121_s27 + $0x60] sm:$0xff]  ;;  %v524_v42 = vld [vmem:[%s1598_s3 + $0x28] sm:$0xff]  ;;  %v522_v44 = vld [vmem:[%s1598_s3 + $0x18] sm:$0xff] }
  0x2f   : > { %537 = vmatpush.msra.mxu0 %v532_v28  ;;  %1015 = vmatpush.msra.mxu2 %v531_v29  ;;  %v523_v43 = vld [vmem:[%s1598_s3 + $0x20] sm:$0xff]  ;;  %v324_v45 = vld [vmem:[%s1126_s30 + $0x78] sm:$0xff]  ;;  %v521_v46 = vld [vmem:[%s1598_s3 + $0x10] sm:$0xff] }
  0x30   : > { %v307_v47 = vld [vmem:[%s1121_s27 + $0x70] sm:$0xff]  ;;  %v308_v48 = vld [vmem:[%s1121_s27 + $0x78] sm:$0xff]  ;;  %v520_v49 = vld [vmem:[%s1598_s3 + $0x8] sm:$0xff] }
  0x31   : > { %538 = vmatpush.msra.mxu0 %v531_v29  ;;  %1016 = vmatpush.msra.mxu2 %v530_v30  ;;  %v519_v50 = vld [vmem:[%s1598_s3] sm:$0xff]  ;;  %v323_v52 = vld [vmem:[%s1126_s30 + $0x70] sm:$0xff]  ;;  %v322_v53 = vld [vmem:[%s1126_s30 + $0x68] sm:$0xff] }
  0x32   : > { %v321_v51 = vld [vmem:[%s1126_s30 + $0x60] sm:$0xff]  ;;  %v318_v54 = vld [vmem:[%s1126_s30 + $0x48] sm:$0xff]  ;;  %v320_v55 = vld [vmem:[%s1126_s30 + $0x58] sm:$0xff] }
  0x33   : > { %367 = vperm.xlu2 %1058, %v290_v8   ;;  %539 = vmatpush.msra.mxu0 %v530_v30  ;;  %v319_v56 = vld [vmem:[%s1126_s30 + $0x50] sm:$0xff]  ;;  %v317_v58 = vld [vmem:[%s1126_s30 + $0x40] sm:$0xff]  ;;  %v316_v59 = vld [vmem:[%s1126_s30 + $0x38] sm:$0xff] }
  0x34   : > { %364 = vperm.xlu0 %1056, %v289_v9   ;;  %334 = vperm.xlu1 %1057, %v279_v10   ;;  %v315_v57 = vld [vmem:[%s1126_s30 + $0x30] sm:$0xff]  ;;  %v312_v62 = vld [vmem:[%s1126_s30 + $0x18] sm:$0xff]  ;;  %v314_v63 = vld [vmem:[%s1126_s30 + $0x28] sm:$0xff] }
  0x35   : > { %1017 = vmatpush.msra.mxu2 %v529_v32  ;;  %540 = vmatpush.msra.mxu0 %v529_v32  ;;  %v313_v0 = vld [vmem:[%s1126_s30 + $0x20] sm:$0xff]  ;;  %v311_v7 = vld [vmem:[%s1126_s30 + $0x10] sm:$0xff]  ;;  %v310_v8 = vld [vmem:[%s1126_s30 + $0x8] sm:$0xff] }
  0x36   : > { %v309_v5 = vld [vmem:[%s1126_s30] sm:$0xff] }
  0x37   : > { %1018 = vmatpush.msra.mxu2 %v528_v35  ;;  %541 = vmatpush.msra.mxu0 %v528_v35 }
  0x39   : > { %1019 = vmatpush.msra.mxu2 %v527_v36  ;;  %542 = vmatpush.msra.mxu0 %v527_v36 }
  0x3b   : > { %340 = vperm.xlu2 %1058, %v281_v11   ;;  %1020 = vmatpush.msra.mxu2 %v526_v37 }
  0x3c   : > { %337 = vperm.xlu0 %1056, %v280_v12   ;;  %370 = vperm.xlu1 %1057, %v291_v13  }
  0x3d   : > { %1021 = vmatpush.msra.mxu2 %v525_v39  ;;  %543 = vmatpush.msra.mxu0 %v526_v37 }
  0x3f   : > { %1022 = vmatpush.msra.mxu2 %v524_v42  ;;  %544 = vmatpush.msra.mxu0 %v525_v39 }
  0x41   : > { %1023 = vmatpush.msra.mxu2 %v523_v43  ;;  %545 = vmatpush.msra.mxu0 %v524_v42 }
  0x43   : > { %346 = vperm.xlu2 %1058, %v283_v14   ;;  %1024 = vmatpush.msra.mxu2 %v522_v44 }
  0x44   : > { %373 = vperm.xlu0 %1056, %v292_v15   ;;  %343 = vperm.xlu1 %1057, %v282_v16  }
  0x45   : > { %1025 = vmatpush.msra.mxu2 %v521_v46  ;;  %546 = vmatpush.msra.mxu0 %v523_v43 }
  0x47   : > { %1026 = vmatpush.msra.mxu2 %v520_v49  ;;  %547 = vmatpush.msra.mxu0 %v522_v44 }
  0x49   : > { %1027 = vmatpush.msra.mxu2 %v519_v50  ;;  %548 = vmatpush.msra.mxu0 %v521_v46 }
  0x4b   : > { %427 = vperm.xlu2 %1058, %v294_v17   ;;  %549 = vmatpush.msra.mxu0 %v520_v49 }
  0x4c   : > { %349 = vperm.xlu0 %1056, %v284_v18   ;;  %424 = vperm.xlu1 %1057, %v293_v19  }
  0x4d   : > { %550 = vmatpush.msra.mxu0 %v519_v50 }
  0x53   : > { %436 = vperm.xlu2 %1058, %v297_v20  }
  0x54   : > { %430 = vperm.xlu0 %1056, %v295_v21   ;;  %433 = vperm.xlu1 %1057, %v296_v22   ;;  %v1071_v22 = vmov 0.0  }
  0x5b   : > { %445 = vperm.xlu2 %1058, %v300_v25  }
  0x5c   : > { %439 = vperm.xlu0 %1056, %v298_v26   ;;  %442 = vperm.xlu1 %1057, %v299_v27  }
  0x63   : > { %454 = vperm.xlu2 %1058, %v303_v31  }
  0x64   : > { %448 = vperm.xlu0 %1056, %v301_v33   ;;  %451 = vperm.xlu1 %1057, %v302_v34  }
  0x6b   : > { %463 = vperm.xlu2 %1058, %v306_v38  }
  0x6c   : > { %457 = vperm.xlu0 %1056, %v304_v40   ;;  %460 = vperm.xlu1 %1057, %v305_v41  }
  0x73   : > { %677 = vperm.xlu2 %1058, %v324_v45  }
  0x74   : > { %466 = vperm.xlu0 %1056, %v307_v47   ;;  %469 = vperm.xlu1 %1057, %v308_v48  }
  0x7b   : > { %662 = vperm.xlu2 %1058, %v321_v51  }
  0x7c   : > { %672 = vperm.xlu0 %1056, %v323_v52   ;;  %667 = vperm.xlu1 %1057, %v322_v53  }
  0x7d   : > { %v362_v61 = vpop.permute.xlu2 %361 }
  0x7e   : > { %vm386_vm6 = vcmp.eq.s32.totalorder %v1286_v1, %v362_v61 }
  0x83   : > { %647 = vperm.xlu2 %1058, %v318_v54  }
  0x84   : > { %657 = vperm.xlu0 %1056, %v320_v55   ;;  %652 = vperm.xlu1 %1057, %v319_v56  }
  0x85   : > { %v332_v6 = vpop.permute.xlu2 %331 }
  0x86   : > { %vm376_vm4 = vcmp.eq.s32.totalorder %v1286_v1, %v332_v6 }
  0x8b   : > { %632 = vperm.xlu2 %1058, %v315_v57  }
  0x8c   : > { %642 = vperm.xlu0 %1056, %v317_v58   ;;  %637 = vperm.xlu1 %1057, %v316_v59  }
  0x8d   : > { %v368_v11 = vpop.permute.xlu2 %367 }
  0x8e   : > { %vm388_vm10 = vcmp.eq.s32.totalorder %v1286_v1, %v368_v11 }
  0x93   : > { %617 = vperm.xlu2 %1058, %v312_v62  }
  0x94   : > { %627 = vperm.xlu0 %1056, %v314_v63   ;;  %622 = vperm.xlu1 %1057, %v313_v0  }
  0x95   : > { %v341_v14 = vpop.permute.xlu2 %340 }
  0x96   : > { %v359_v2 = vpop.permute.xlu1 %358  ;;  %v353_v3 = vpop.permute.xlu0 %352  ;;  %vm379_vm11 = vcmp.eq.s32.totalorder %v1286_v1, %v341_v14 }
  0x97   : > { %vm383_vm1 = vcmp.eq.s32.totalorder %v1286_v1, %v353_v3  ;;  %vm385_vm5 = vcmp.eq.s32.totalorder %v1286_v1, %v359_v2 }
  0x98   : > { %1001 = vmatmul.msk.f32.vlgmr.msra.gmra.mxu2 %vm383_vm1, %v1070_v4 }
  0x9b   : > { %602 = vperm.xlu2 %1058, %v309_v5  }
  0x9c   : > { %612 = vperm.xlu0 %1056, %v311_v7   ;;  %607 = vperm.xlu1 %1057, %v310_v8  }
  0x9d   : > { %v347_v19 = vpop.permute.xlu2 %346 }
  0x9e   : > { %v356_v9 = vpop.permute.xlu0 %355  ;;  %v329_v10 = vpop.permute.xlu1 %328  ;;  %vm381_vm1 = vcmp.eq.s32.totalorder %v1286_v1, %v347_v19 }
  0x9f   : > { %vm384_vm2 = vcmp.eq.s32.totalorder %v1286_v1, %v356_v9  ;;  %vm375_vm3 = vcmp.eq.s32.totalorder %v1286_v1, %v329_v10 }
  0xa0   : > { %993 = vmatmul.msk.f32.vlgmr.msra.gmra.mxu0 %vm375_vm3, %v1070_v4  ;;  %1002 = vmatmul.msk.f32.gmra.mxu2 %vm384_vm2, %v1070_v4 }
  0xa5   : > { %v428_v24 = vpop.permute.xlu2 %427 }
  0xa6   : > { %v365_v12 = vpop.permute.xlu0 %364  ;;  %v335_v13 = vpop.permute.xlu1 %334  ;;  %vm472_vm13 = vcmp.eq.s32.totalorder %v1286_v1, %v428_v24 }
  0xa7   : > { %vm377_vm7 = vcmp.eq.s32.totalorder %v1286_v1, %v335_v13  ;;  %vm387_vm8 = vcmp.eq.s32.totalorder %v1286_v1, %v365_v12  ;;  %v978_v25 = vsel %vm472_vm13, 1.0, %v1071_v22 }
  0xa8   : > { %994 = vmatmul.msk.f32.gmra.mxu0 %vm376_vm4, %v1070_v4  ;;  %1003 = vmatmul.msk.f32.gmra.mxu2 %vm385_vm5, %v1070_v4 }
  0xad   : > { %v437_v30 = vpop.permute.xlu2 %436 }
  0xae   : > { %v338_v15 = vpop.permute.xlu0 %337  ;;  %v371_v16 = vpop.permute.xlu1 %370  ;;  %vm475_vm5 = vcmp.eq.s32.totalorder %v1286_v1, %v437_v30 }
  0xaf   : > { %vm378_vm9 = vcmp.eq.s32.totalorder %v1286_v1, %v338_v15  ;;  %vm389_vm14 = vcmp.eq.s32.totalorder %v1286_v1, %v371_v16  ;;  %v981_v31 = vsel %vm475_vm5, 1.0, %v1071_v22 }
  0xb0   : > { %995 = vmatmul.msk.f32.gmra.mxu0 %vm377_vm7, %v1070_v4  ;;  %1004 = vmatmul.msk.f32.gmra.mxu2 %vm386_vm6, %v1070_v4 }
  0xb5   : > { %v446_v36 = vpop.permute.xlu2 %445 }
  0xb6   : > { %v374_v17 = vpop.permute.xlu0 %373  ;;  %v344_v18 = vpop.permute.xlu1 %343 }
  0xb7   : > { %vm380_vm15 = vcmp.eq.s32.totalorder %v1286_v1, %v344_v18  ;;  %vm390_vm2 = vcmp.eq.s32.totalorder %v1286_v1, %v374_v17 }
  0xb8   : > { %996 = vmatmul.msk.f32.gmra.mxu0 %vm378_vm9, %v1070_v4  ;;  %1005 = vmatmul.msk.f32.gmra.mxu2 %vm387_vm8, %v1070_v4  ;;  %vm478_vm8 = vcmp.eq.s32.totalorder %v1286_v1, %v446_v36 }
  0xb9   : > { %v984_v37 = vsel %vm478_vm8, 1.0, %v1071_v22 }
  0xbd   : > { %v455_v42 = vpop.permute.xlu2 %454 }
  0xbe   : > { %v425_v20 = vpop.permute.xlu1 %424  ;;  %v350_v21 = vpop.permute.xlu0 %349 }
  0xbf   : > { %vm471_vm12 = vcmp.eq.s32.totalorder %v1286_v1, %v425_v20  ;;  %vm382_vm4 = vcmp.eq.s32.totalorder %v1286_v1, %v350_v21 }
  0xc0   : > { %v977_v23 = vsel %vm471_vm12, 1.0, %v1071_v22  ;;  %997 = vmatmul.msk.f32.gmra.mxu0 %vm379_vm11, %v1070_v4  ;;  %1006 = vmatmul.msk.f32.gmra.mxu2 %vm388_vm10, %v1070_v4  ;;  %vm481_vm11 = vcmp.eq.s32.totalorder %v1286_v1, %v455_v42 }
  0xc1   : > { %712 = vxpose.xlu0.b32.start [1/16] %v977_v23, 128  ;;  %v987_v43 = vsel %vm481_vm11, 1.0, %v1071_v22 }
  0xc5   : > { %v464_v50 = vpop.permute.xlu2 %463 }
  0xc6   : > { %v431_v26 = vpop.permute.xlu0 %430  ;;  %v434_v28 = vpop.permute.xlu1 %433 }
  0xc7   : > { %vm473_vm0 = vcmp.eq.s32.totalorder %v1286_v1, %v431_v26  ;;  %vm474_vm3 = vcmp.eq.s32.totalorder %v1286_v1, %v434_v28 }
  0xc8   : > { %998 = vmatmul.msk.f32.gmra.mxu0 %vm380_vm15, %v1070_v4  ;;  %1007 = vmatmul.msk.f32.gmra.mxu2 %vm389_vm14, %v1070_v4  ;;  %v979_v27 = vsel %vm473_vm0, 1.0, %v1071_v22  ;;  %v980_v29 = vsel %vm474_vm3, 1.0, %v1071_v22  ;;  %vm484_vm14 = vcmp.eq.s32.totalorder %v1286_v1, %v464_v50 }
  0xc9   : > { %713 = vxpose.xlu0.b32.cont [2/16] %v978_v25, 128  ;;  %v990_v53 = vsel %vm484_vm14, 1.0, %v1071_v22 }
  0xcd   : > { %v678_v0 = vpop.permute.xlu2 %677 }
  0xce   : > { %v440_v32 = vpop.permute.xlu0 %439  ;;  %v443_v34 = vpop.permute.xlu1 %442 }
  0xcf   : > { %vm476_vm6 = vcmp.eq.s32.totalorder %v1286_v1, %v440_v32  ;;  %vm477_vm7 = vcmp.eq.s32.totalorder %v1286_v1, %v443_v34 }
  0xd0   : > { %999 = vmatmul.msk.f32.gmra.mxu0 %vm381_vm1, %v1070_v4  ;;  %1008 = vmatmul.msk.f32.gmra.mxu2 %vm390_vm2, %v1070_v4  ;;  %v982_v33 = vsel %vm476_vm6, 1.0, %v1071_v22  ;;  %v983_v35 = vsel %vm477_vm7, 1.0, %v1071_v22  ;;  %vm825_vm1 = vcmask 523264  }
  0xd1   : > { %714 = vxpose.xlu0.b32.cont [3/16] %v979_v27, 128 }
  0xd5   : > { %v663_v6 = vpop.permute.xlu2 %662 }
  0xd6   : > { %v449_v38 = vpop.permute.xlu0 %448  ;;  %v452_v40 = vpop.permute.xlu1 %451 }
  0xd7   : > { %vm479_vm9 = vcmp.eq.s32.totalorder %v1286_v1, %v449_v38  ;;  %vm480_vm10 = vcmp.eq.s32.totalorder %v1286_v1, %v452_v40 }
  0xd8   : > { %1000 = vmatmul.msk.f32.gmra.mxu0 %vm382_vm4, %v1070_v4  ;;  %v985_v39 = vsel %vm479_vm9, 1.0, %v1071_v22  ;;  %v986_v41 = vsel %vm480_vm10, 1.0, %v1071_v22 }
  0xd9   : > { %715 = vxpose.xlu0.b32.cont [4/16] %v980_v29, 128 }
  0xdd   : > { %v648_v11 = vpop.permute.xlu2 %647 }
  0xde   : > { %v458_v44 = vpop.permute.xlu0 %457  ;;  %v461_v46 = vpop.permute.xlu1 %460 }
  0xdf   : > { %vm482_vm12 = vcmp.eq.s32.totalorder %v1286_v1, %v458_v44  ;;  %vm483_vm13 = vcmp.eq.s32.totalorder %v1286_v1, %v461_v46 }
  0xe0   : > { %v988_v45 = vsel %vm482_vm12, 1.0, %v1071_v22  ;;  %v989_v49 = vsel %vm483_vm13, 1.0, %v1071_v22 }
  0xe1   : > { %716 = vxpose.xlu0.b32.cont [5/16] %v981_v31, 128 }
  0xe5   : > { %v633_v20 = vpop.permute.xlu2 %632 }
  0xe6   : > { %v467_v54 = vpop.permute.xlu0 %466  ;;  %v470_v58 = vpop.permute.xlu1 %469 }
  0xe7   : > { %vm485_vm15 = vcmp.eq.s32.totalorder %v1286_v1, %v467_v54  ;;  %vm486_vm0 = vcmp.eq.s32.totalorder %v1286_v1, %v470_v58  ;;  %v696_v54 = vld [vmem:[%s1600_s5] sm:$0xff] }
  0xe8   : > { %v991_v57 = vsel %vm485_vm15, 1.0, %v1071_v22  ;;  %v992_v61 = vsel %vm486_vm0, 1.0, %v1071_v22 }
  0xe9   : > { %717 = vxpose.xlu0.b32.cont [6/16] %v982_v33, 128 }
  0xed   : > { %v618_v30 = vpop.permute.xlu2 %617 }
  0xee   : > { %v673_v60 = vpop.permute.xlu0 %672  ;;  %v668_v5 = vpop.permute.xlu1 %667 }
  0xf1   : > { %718 = vxpose.xlu0.b32.cont [7/16] %v983_v35, 128 }
  0xf5   : > { %v603_v38 = vpop.permute.xlu2 %602 }
  0xf6   : > { %v658_v2 = vpop.permute.xlu0 %657  ;;  %v653_v10 = vpop.permute.xlu1 %652 }
  0xf9   : > { %719 = vxpose.xlu0.b32.cont [8/16] %v984_v37, 128 }
  0xfe   : > { %v643_v7 = vpop.permute.xlu0 %642  ;;  %v638_v18 = vpop.permute.xlu1 %637 }
 0x101   : > { %720 = vxpose.xlu0.b32.cont [9/16] %v985_v39, 128 }
 0x106   : > { %v628_v12 = vpop.permute.xlu0 %627  ;;  %v623_v27 = vpop.permute.xlu1 %622 }
 0x109   : > { %721 = vxpose.xlu0.b32.cont [10/16] %v986_v41, 128 }
 0x10e   : > { %v613_v21 = vpop.permute.xlu0 %612  ;;  %v608_v36 = vpop.permute.xlu1 %607 }
 0x111   : > { %722 = vxpose.xlu0.b32.cont [11/16] %v987_v43, 128 }
 0x119   : > { %723 = vxpose.xlu0.b32.cont [12/16] %v988_v45, 128 }
 0x11b   : > { %v576_v47 = vpop.f32.mrf.mxu2 }
 0x11c   : > { %v688_v25 = vmul.f32 %v643_v7, %v576_v47 }
 0x11d   : > { %v1348_v48 = vpop.f32.mrf.mxu0 }
 0x11e   : > { %v680_v39 = vmul.f32 %v603_v38, %v1348_v48 }
 0x121   : > { %724 = vxpose.xlu0.b32.cont [13/16] %v989_v49, 128 }
 0x123   : > { %v579_v51 = vpop.f32.mrf.mxu2 }
 0x124   : > { %v689_v23 = vmul.f32 %v648_v11, %v579_v51 }
 0x125   : > { %v1352_v52 = vpop.f32.mrf.mxu0 }
 0x126   : > { %v681_v37 = vmul.f32 %v608_v36, %v1352_v52 }
 0x129   : > { %725 = vxpose.xlu0.b32.cont [14/16] %v990_v53, 128 }
 0x12b   : > { %v582_v55 = vpop.f32.mrf.mxu2 }
 0x12c   : > { %v690_v22 = vmul.f32 %v653_v10, %v582_v55 }
 0x12d   : > { %v1356_v56 = vpop.f32.mrf.mxu0 }
 0x12e   : > { %v682_v35 = vmul.f32 %v613_v21, %v1356_v56 }
 0x131   : > { %726 = vxpose.xlu0.b32.cont [15/16] %v991_v57, 128  ;;  %v697_v57 = vld [vmem:[%s1600_s5 + $0x8] sm:$0xff] }
 0x133   : > { %v585_v59 = vpop.f32.mrf.mxu2 }
 0x134   : > { %v691_v19 = vmul.f32 %v658_v2, %v585_v59 }
 0x135   : > { %v561_v62 = vpop.f32.mrf.mxu0 }
 0x136   : > { %v683_v33 = vmul.f32 %v618_v30, %v561_v62 }
 0x139   : > { %727 = vxpose.xlu0.b32.end [16/16] %v992_v61, 128 }
 0x13b   : > { %v588_v63 = vpop.f32.mrf.mxu2 }
 0x13c   : > { %v692_v17 = vmul.f32 %v663_v6, %v588_v63  ;;  %v699_v63 = vld [vmem:[%s1600_s5 + $0x18] sm:$0xff]  ;;  %v701_v6 = vld [vmem:[%s1600_s5 + $0x28] sm:$0xff] }
 0x13d   : > { %v564_v3 = vpop.f32.mrf.mxu0 }
 0x13e   : > { %v684_v32 = vmul.f32 %v623_v27, %v564_v3  ;;  %v700_v3 = vld [vmem:[%s1600_s5 + $0x20] sm:$0xff] }
 0x143   : > { %v591_v4 = vpop.f32.mrf.mxu2 }
 0x144   : > { %v693_v16 = vmul.f32 %v668_v5, %v591_v4 }
 0x145   : > { %v567_v9 = vpop.f32.mrf.mxu0 }
 0x146   : > { %v685_v31 = vmul.f32 %v628_v12, %v567_v9  ;;  %v702_v9 = vld [vmem:[%s1600_s5 + $0x30] sm:$0xff]  ;;  %v704_v12 = vld [vmem:[%s1600_s5 + $0x40] sm:$0xff] }
 0x14b   : > { %v594_v8 = vpop.f32.mrf.mxu2 }
 0x14c   : > { %v694_v14 = vmul.f32 %v673_v60, %v594_v8  ;;  %v698_v60 = vld [vmem:[%s1600_s5 + $0x10] sm:$0xff] }
 0x14d   : > { %v570_v15 = vpop.f32.mrf.mxu0 }
 0x14e   : > { %v686_v29 = vmul.f32 %v633_v20, %v570_v15  ;;  %v706_v20 = vld [vmem:[%s1600_s5 + $0x50] sm:$0xff] }
 0x153   : > { %v597_v13 = vpop.f32.mrf.mxu2 }
 0x154   : > { %v695_v1 = vmul.f32 %v678_v0, %v597_v13  ;;  %v703_v13 = vld [vmem:[%s1600_s5 + $0x38] sm:$0xff] }
 0x155   : > { %v573_v24 = vpop.f32.mrf.mxu0 }
 0x156   : > { %744 = vmatpush.msra.mxu1 %v695_v1  ;;  %1028 = vmatpush.msra.mxu3 %v695_v1  ;;  %v687_v26 = vmul.f32 %v638_v18, %v573_v24 }
 0x158   : > { %745 = vmatpush.msra.mxu1 %v694_v14  ;;  %1029 = vmatpush.msra.mxu3 %v694_v14 }
 0x15a   : > { %746 = vmatpush.msra.mxu1 %v693_v16  ;;  %1030 = vmatpush.msra.mxu3 %v693_v16 }
 0x15c   : > { %747 = vmatpush.msra.mxu1 %v692_v17  ;;  %1031 = vmatpush.msra.mxu3 %v692_v17  ;;  %v705_v17 = vld [vmem:[%s1600_s5 + $0x48] sm:$0xff] }
 0x15e   : > { %748 = vmatpush.msra.mxu1 %v691_v19  ;;  %1032 = vmatpush.msra.mxu3 %v691_v19 }
 0x160   : > { %749 = vmatpush.msra.mxu1 %v690_v22  ;;  %1033 = vmatpush.msra.mxu3 %v690_v22 }
 0x162   : > { %750 = vmatpush.msra.mxu1 %v689_v23  ;;  %1034 = vmatpush.msra.mxu3 %v689_v23  ;;  %v707_v23 = vld [vmem:[%s1600_s5 + $0x58] sm:$0xff] }
 0x164   : > { %751 = vmatpush.msra.mxu1 %v688_v25  ;;  %1035 = vmatpush.msra.mxu3 %v688_v25 }
 0x165   : > { %v728_v28 = vpop.trf.xlu0 }
 0x166   : > { %752 = vmatpush.msra.mxu1 %v687_v26  ;;  %1036 = vmatpush.msra.mxu3 %v687_v26  ;;  %v708_v26 = vld [vmem:[%s1600_s5 + $0x60] sm:$0xff] }
 0x168   : > { %753 = vmatpush.msra.mxu1 %v686_v29  ;;  %1037 = vmatpush.msra.mxu3 %v686_v29  ;;  %v709_v29 = vld [vmem:[%s1600_s5 + $0x68] sm:$0xff] }
 0x16a   : > { %754 = vmatpush.msra.mxu1 %v685_v31  ;;  %1038 = vmatpush.msra.mxu3 %v685_v31 }
 0x16c   : > { %755 = vmatpush.msra.mxu1 %v684_v32  ;;  %1039 = vmatpush.msra.mxu3 %v684_v32  ;;  %v710_v32 = vld [vmem:[%s1600_s5 + $0x70] sm:$0xff] }
 0x16d   : > { %v729_v34 = vpop.trf.xlu0 }
 0x16e   : > { %756 = vmatpush.msra.mxu1 %v683_v33  ;;  %1040 = vmatpush.msra.mxu3 %v683_v33 }
 0x170   : > { %757 = vmatpush.msra.mxu1 %v682_v35  ;;  %1041 = vmatpush.msra.mxu3 %v682_v35  ;;  %v711_v35 = vld [vmem:[%s1600_s5 + $0x78] sm:$0xff] }
 0x172   : > { %758 = vmatpush.msra.mxu1 %v681_v37  ;;  %1042 = vmatpush.msra.mxu3 %v681_v37 }
 0x174   : > { %759 = vmatpush.msra.mxu1 %v680_v39  ;;  %1043 = vmatpush.msra.mxu3 %v680_v39 }
 0x175   : > { %v730_v40 = vpop.trf.xlu0  ;;  %760 = vmatmul.f32.vlgmr.msra.gmra.mxu1 %v728_v28 }
 0x17d   : > { %v731_v41 = vpop.trf.xlu0  ;;  %763 = vmatmul.f32.gmra.mxu1 %v729_v34 }
 0x185   : > { %v732_v42 = vpop.trf.xlu0  ;;  %766 = vmatmul.f32.gmra.mxu1 %v730_v40 }
 0x18d   : > { %v733_v43 = vpop.trf.xlu0  ;;  %769 = vmatmul.f32.gmra.mxu1 %v731_v41 }
 0x195   : > { %v734_v44 = vpop.trf.xlu0  ;;  %772 = vmatmul.f32.gmra.mxu1 %v732_v42 }
 0x19d   : > { %v735_v45 = vpop.trf.xlu0  ;;  %775 = vmatmul.f32.gmra.mxu1 %v733_v43 }
 0x1a5   : > { %v736_v46 = vpop.trf.xlu0  ;;  %778 = vmatmul.f32.gmra.mxu1 %v734_v44 }
 0x1a6   : > { %784 = vmatmul.f32.vlgmr.msra.gmra.mxu3 %v736_v46 }
 0x1ad   : > { %v737_v47 = vpop.trf.xlu0  ;;  %781 = vmatmul.f32.gmra.mxu1 %v735_v45 }
 0x1ae   : > { %787 = vmatmul.f32.gmra.mxu3 %v737_v47 }
 0x1b5   : > { %v738_v48 = vpop.trf.xlu0 }
 0x1b6   : > { %790 = vmatmul.f32.gmra.mxu3 %v738_v48 }
 0x1bd   : > { %v739_v49 = vpop.trf.xlu0 }
 0x1be   : > { %793 = vmatmul.f32.gmra.mxu3 %v739_v49 }
 0x1c5   : > { %v740_v50 = vpop.trf.xlu0 }
 0x1c6   : > { %796 = vmatmul.f32.gmra.mxu3 %v740_v50 }
 0x1cd   : > { %v741_v51 = vpop.trf.xlu0 }
 0x1ce   : > { %799 = vmatmul.f32.gmra.mxu3 %v741_v51 }
 0x1d5   : > { %v742_v52 = vpop.trf.xlu0 }
 0x1d6   : > { %802 = vmatmul.f32.gmra.mxu3 %v742_v52 }
 0x1dd   : > { %v743_v53 = vpop.trf.xlu0 }
 0x1de   : > { %805 = vmatmul.f32.gmra.mxu3 %v743_v53 }
 0x1f2   : > { %v761_v55 = vpop.f32.mrf.mxu1 }
 0x1f3   : > { %v809_v56 = vadd.f32 %v761_v55, %v696_v54 }
 0x1f5   : > { %826 = vst.msk [vmem:[%s1600_s5] sm:$0xff] %vm825_vm1, %v809_v56 }
 0x1fa   : > { %v764_v58 = vpop.f32.mrf.mxu1 }
 0x1fb   : > { %v810_v59 = vadd.f32 %v764_v58, %v697_v57 }
 0x1fd   : > { %827 = vst.msk [vmem:[%s1600_s5 + $0x8] sm:$0xff] %vm825_vm1, %v810_v59 }
 0x202   : > { %v767_v61 = vpop.f32.mrf.mxu1 }
 0x203   : > { %v811_v62 = vadd.f32 %v767_v61, %v698_v60 }
 0x205   : > { %828 = vst.msk [vmem:[%s1600_s5 + $0x10] sm:$0xff] %vm825_vm1, %v811_v62 }
 0x20a   : > { %v770_v0 = vpop.f32.mrf.mxu1 }
 0x20b   : > { %v812_v2 = vadd.f32 %v770_v0, %v699_v63 }
 0x20d   : > { %829 = vst.msk [vmem:[%s1600_s5 + $0x18] sm:$0xff] %vm825_vm1, %v812_v2 }
 0x212   : > { %v773_v4 = vpop.f32.mrf.mxu1 }
 0x213   : > { %v813_v5 = vadd.f32 %v773_v4, %v700_v3 }
 0x215   : > { %830 = vst.msk [vmem:[%s1600_s5 + $0x20] sm:$0xff] %vm825_vm1, %v813_v5 }
 0x21a   : > { %v776_v7 = vpop.f32.mrf.mxu1 }
 0x21b   : > { %v814_v8 = vadd.f32 %v776_v7, %v701_v6 }
 0x21d   : > { %831 = vst.msk [vmem:[%s1600_s5 + $0x28] sm:$0xff] %vm825_vm1, %v814_v8 }
 0x222   : > { %v779_v10 = vpop.f32.mrf.mxu1 }
 0x223   : > { %v815_v11 = vadd.f32 %v779_v10, %v702_v9 }
 0x225   : > { %832 = vst.msk [vmem:[%s1600_s5 + $0x30] sm:$0xff] %vm825_vm1, %v815_v11 }
 0x229   : > { %v785_v1 = vpop.f32.mrf.mxu3 }
 0x22a   : > { %v817_v14 = vadd.f32 %v785_v1, %v704_v12  ;;  %v782_v15 = vpop.f32.mrf.mxu1 }
 0x22b   : > { %v816_v16 = vadd.f32 %v782_v15, %v703_v13 }
 0x22c   : > { %834 = vst.msk [vmem:[%s1600_s5 + $0x40] sm:$0xff] %vm825_vm1, %v817_v14 }
 0x22d   : > { %833 = vst.msk [vmem:[%s1600_s5 + $0x38] sm:$0xff] %vm825_vm1, %v816_v16 }
 0x231   : > { %v788_v18 = vpop.f32.mrf.mxu3 }
 0x232   : > { %v818_v19 = vadd.f32 %v788_v18, %v705_v17 }
 0x234   : > { %835 = vst.msk [vmem:[%s1600_s5 + $0x48] sm:$0xff] %vm825_vm1, %v818_v19 }
 0x239   : > { %v791_v21 = vpop.f32.mrf.mxu3 }
 0x23a   : > { %v819_v22 = vadd.f32 %v791_v21, %v706_v20 }
 0x23c   : > { %836 = vst.msk [vmem:[%s1600_s5 + $0x50] sm:$0xff] %vm825_vm1, %v819_v22 }
 0x241   : > { %v794_v24 = vpop.f32.mrf.mxu3 }
 0x242   : > { %v820_v25 = vadd.f32 %v794_v24, %v707_v23 }
 0x244   : > { %837 = vst.msk [vmem:[%s1600_s5 + $0x58] sm:$0xff] %vm825_vm1, %v820_v25 }
 0x249   : > { %v797_v27 = vpop.f32.mrf.mxu3 }
 0x24a   : > { %v821_v28 = vadd.f32 %v797_v27, %v708_v26 }
 0x24c   : > { %838 = vst.msk [vmem:[%s1600_s5 + $0x60] sm:$0xff] %vm825_vm1, %v821_v28 }
 0x251   : > { %v800_v30 = vpop.f32.mrf.mxu3 }
 0x252   : > { %v822_v31 = vadd.f32 %v800_v30, %v709_v29 }
 0x254   : > { %839 = vst.msk [vmem:[%s1600_s5 + $0x68] sm:$0xff] %vm825_vm1, %v822_v31 }
 0x259   : > { %v803_v33 = vpop.f32.mrf.mxu3 }
 0x25a   : > { %v823_v34 = vadd.f32 %v803_v33, %v710_v32 }
 0x25c   : > { %840 = vst.msk [vmem:[%s1600_s5 + $0x70] sm:$0xff] %vm825_vm1, %v823_v34 }
 0x260   : > { %845 = sbr.rel (%p1009_p5) target bundleno = 633 (0x279), region = 48 }
 0x261   : > { %v806_v36 = vpop.f32.mrf.mxu3 }
 0x262   : > { %v824_v37 = vadd.f32 %v806_v36, %v711_v35 }
 0x264   : > { %841 = vst.msk [vmem:[%s1600_s5 + $0x78] sm:$0xff] %vm825_vm1, %v824_v37 }
 0x265   : > { %v846_v38 = vld [vmem:[%s1600_s5] sm:$0xff]  ;;  %v847_v40 = vld [vmem:[%s1600_s5 + $0x8] sm:$0xff]  ;;  %v848_v41 = vld [vmem:[%s1600_s5 + $0x10] sm:$0xff] }
 0x266   : > { %v1059_v39 = vld [vmem:[%s1599_s4] ss:$0 sm:$0xff]  ;;  %v849_v42 = vld [vmem:[%s1600_s5 + $0x18] sm:$0xff]  ;;  %v851_v47 = vld [vmem:[%s1600_s5 + $0x28] sm:$0xff] }
 0x267   : > { %v866_v43 = vadd.f32 %v1059_v39, %v846_v38  ;;  %v867_v44 = vadd.f32 %v1059_v39, %v847_v40  ;;  %v868_v45 = vadd.f32 %v1059_v39, %v848_v41  ;;  %v850_v46 = vld [vmem:[%s1600_s5 + $0x20] sm:$0xff]  ;;  %v869_v48 = vadd.f32 %v1059_v39, %v849_v42  ;;  %v852_v49 = vld [vmem:[%s1600_s5 + $0x30] sm:$0xff]  ;;  %v853_v51 = vld [vmem:[%s1600_s5 + $0x38] sm:$0xff] }
 0x268   : > { %v870_v50 = vadd.f32 %v1059_v39, %v850_v46  ;;  %v871_v52 = vadd.f32 %v1059_v39, %v851_v47  ;;  %v854_v53 = vld [vmem:[%s1600_s5 + $0x40] sm:$0xff]  ;;  %v872_v54 = vadd.f32 %v1059_v39, %v852_v49  ;;  %v855_v55 = vld [vmem:[%s1600_s5 + $0x48] sm:$0xff]  ;;  %v873_v56 = vadd.f32 %v1059_v39, %v853_v51  ;;  %v856_v57 = vld [vmem:[%s1600_s5 + $0x50] sm:$0xff] }
 0x269   : > { %882 = vst.msk [vmem:[%s1600_s5] sm:$0xff] %vm825_vm1, %v866_v43  ;;  %v874_v58 = vadd.f32 %v1059_v39, %v854_v53  ;;  %v857_v59 = vld [vmem:[%s1600_s5 + $0x58] sm:$0xff]  ;;  %v875_v60 = vadd.f32 %v1059_v39, %v855_v55  ;;  %v858_v61 = vld [vmem:[%s1600_s5 + $0x60] sm:$0xff]  ;;  %v876_v62 = vadd.f32 %v1059_v39, %v856_v57  ;;  %v859_v63 = vld [vmem:[%s1600_s5 + $0x68] sm:$0xff] }
 0x26a   : > { %883 = vst.msk [vmem:[%s1600_s5 + $0x8] sm:$0xff] %vm825_vm1, %v867_v44  ;;  %v877_v0 = vadd.f32 %v1059_v39, %v857_v59  ;;  %v860_v2 = vld [vmem:[%s1600_s5 + $0x70] sm:$0xff]  ;;  %v878_v3 = vadd.f32 %v1059_v39, %v858_v61  ;;  %v879_v5 = vadd.f32 %v1059_v39, %v859_v63 }
 0x26b   : > { %884 = vst.msk [vmem:[%s1600_s5 + $0x10] sm:$0xff] %vm825_vm1, %v868_v45  ;;  %v861_v4 = vld [vmem:[%s1600_s5 + $0x78] sm:$0xff]  ;;  %v880_v6 = vadd.f32 %v1059_v39, %v860_v2 }
 0x26c   : > { %885 = vst.msk [vmem:[%s1600_s5 + $0x18] sm:$0xff] %vm825_vm1, %v869_v48  ;;  %v881_v7 = vadd.f32 %v1059_v39, %v861_v4 }
 0x26d   : > { %886 = vst.msk [vmem:[%s1600_s5 + $0x20] sm:$0xff] %vm825_vm1, %v870_v50 }
 0x26e   : > { %887 = vst.msk [vmem:[%s1600_s5 + $0x28] sm:$0xff] %vm825_vm1, %v871_v52 }
 0x26f   : > { %888 = vst.msk [vmem:[%s1600_s5 + $0x30] sm:$0xff] %vm825_vm1, %v872_v54 }
 0x270   : > { %889 = vst.msk [vmem:[%s1600_s5 + $0x38] sm:$0xff] %vm825_vm1, %v873_v56 }
 0x271   : > { %890 = vst.msk [vmem:[%s1600_s5 + $0x40] sm:$0xff] %vm825_vm1, %v874_v58 }
 0x272   : > { %891 = vst.msk [vmem:[%s1600_s5 + $0x48] sm:$0xff] %vm825_vm1, %v875_v60 }
 0x273   : > { %892 = vst.msk [vmem:[%s1600_s5 + $0x50] sm:$0xff] %vm825_vm1, %v876_v62 }
 0x274   : > { %893 = vst.msk [vmem:[%s1600_s5 + $0x58] sm:$0xff] %vm825_vm1, %v877_v0 }
 0x275   : > { %894 = vst.msk [vmem:[%s1600_s5 + $0x60] sm:$0xff] %vm825_vm1, %v878_v3 }
 0x276   : > { %895 = vst.msk [vmem:[%s1600_s5 + $0x68] sm:$0xff] %vm825_vm1, %v879_v5 }
 0x277   : > { %896 = vst.msk [vmem:[%s1600_s5 + $0x70] sm:$0xff] %vm825_vm1, %v880_v6 }
 0x278   : > { %897 = vst.msk [vmem:[%s1600_s5 + $0x78] sm:$0xff] %vm825_vm1, %v881_v7 }
 0x279 PF: > { %s15_s18 = sadd.s32 1, %s1066_s18  }
 0x27a   : > { %p12_p6 = scmp.ge.s32.totalorder %s15_s18, 6  }
 0x27c   :  { %14 = sbr.rel (!%p12_p6) target bundleno = 1 (0x1), region = 80 }

</bundles_post_ra>
